<compile_context>
chip_gen: v7x
topology: tpu7x:2x2x1
jax: 0.10.0
libtpu: 0.0.40
codegen_flags: <defaults>
</compile_context>

<pallas_src>
import functools
import math

import jax
import jax.numpy as jnp
from jax.experimental import pallas as pl
from jax.experimental.pallas import tpu as pltpu

# --- small hyperparameters consistent with the module structure ---
N_EMBD = 32        # reference: 384
N_HEAD = 4         # reference: 6
N_LAYER = 2        # reference: 6
BLOCK_SIZE = 16    # reference: 256
VOCAB_SIZE = 64    # reference snippet has vocab_size = 0 (set from data); pick 64
HEAD_SIZE = N_EMBD // N_HEAD
LN_EPS = 1e-5      # torch.nn.LayerNorm default
VOCAB_PAD = ((VOCAB_SIZE + 127) // 128) * 128   # lane-dense logits store

# Set to jnp.bfloat16 on v6e/v7x to hit the bf16-native MXU path at reference
# scale (accumulation stays f32 via preferred_element_type). Default f32 keeps
# the forward numerically faithful to the PyTorch reference.
MXU_DTYPE = jnp.float32


def _mxu(t):
    return t.astype(MXU_DTYPE)


def _layernorm(v, w, b):
    mu = jnp.mean(v, axis=-1, keepdims=True)
    var = jnp.mean(jnp.square(v - mu), axis=-1, keepdims=True)
    return (v - mu) * jax.lax.rsqrt(var + LN_EPS) * w + b


def fused_gpt_kernel(x_ref, ln1w_ref, ln1b_ref, wqkv_ref, wproj_ref, bproj_ref,
                     ln2w_ref, ln2b_ref, w1_ref, b1_ref, w2_ref, b2_ref,
                     lnfw_ref, lnfb_ref, wlm_ref, blm_ref, logits_ref, *, B, T):
    N, C = x_ref.shape                    # N = B*T
    H, HS = N_HEAD, HEAD_SIZE
    L = wqkv_ref.shape[0]
    f32 = jnp.float32

    # causal mask, shared by all layers: tril[:T, :T] != 0
    row = jax.lax.broadcasted_iota(jnp.int32, (T, T), 0)
    col = jax.lax.broadcasted_iota(jnp.int32, (T, T), 1)
    causal = row >= col
    inv_scale = 1.0 / math.sqrt(B)        # reference: sqrt(len(k)) == sqrt(B)

    x = x_ref[...]                        # resident in VMEM across all layers

    for l in range(L):                    # unrolled; weights statically indexed
        # ---- multi-head self-attention on ln1(x), all heads batched ----
        h = _layernorm(x, ln1w_ref[l], ln1b_ref[l])                   # (N, C)
        # one head-batched matmul produces [q|k|v] for each head (3*HS lanes
        # per pass); the activation is only broadcast H-deep.
        hb = jnp.broadcast_to(_mxu(h)[None], (H, N, C))
        qkv = jnp.einsum('hnc,hcd->hnd', hb, _mxu(wqkv_ref[l]),
                         preferred_element_type=f32)                  # (H, N, 3*HS)
        # static lane slices; fold 1/sqrt(B) into q (masked scores stay -inf)
        q = (qkv[..., 0:HS] * inv_scale).reshape(H * B, T, HS)
        k = qkv[..., HS:2 * HS].reshape(H * B, T, HS)
        v = qkv[..., 2 * HS:3 * HS].reshape(H * B, T, HS)

        s = jnp.einsum('ntd,nsd->nts', _mxu(q), _mxu(k),
                       preferred_element_type=f32)                    # (H*B, T, T)
        s = jnp.where(causal[None], s, -jnp.inf)
        # Faithful to the reference: softmax over dim=0 (the batch axis).
        s4 = s.reshape(H, B, T, T)
        m = jnp.max(s4, axis=1, keepdims=True)
        e = jnp.exp(s4 - m)
        denom = jnp.sum(e, axis=1, keepdims=True)
        alpha = (e * pl.reciprocal(denom, approx=True)).reshape(H * B, T, T)
        ctx = jnp.einsum('nts,nsd->ntd', _mxu(alpha), _mxu(v),
                         preferred_element_type=f32)                  # (H*B, T, HS)

        # Head-batched output projection; summing over the head axis equals
        # concat(heads, axis=-1) @ Wproj (no lane-dim concatenate needed).
        # TODO(synk): reference does torch.cat(context) along dim=0, which makes
        # the following Linear (and residual add) shape-invalid; the only
        # shape-consistent reading (feature-dim concat) is used.
        ctx = ctx.reshape(H, N, HS)
        sa = jnp.einsum('hnd,hdj->hnj', _mxu(ctx), _mxu(wproj_ref[l]),
                        preferred_element_type=f32)                   # (H, N, C)
        x = x + jnp.sum(sa, axis=0) + bproj_ref[l]

        # ---- feed-forward on ln2(x) ----
        h = _layernorm(x, ln2w_ref[l], ln2b_ref[l])
        ff = jnp.dot(_mxu(h), _mxu(w1_ref[l]),
                     preferred_element_type=f32) + b1_ref[l]
        ff = jnp.maximum(ff, 0.0)
        ff = jnp.dot(_mxu(ff), _mxu(w2_ref[l]),
                     preferred_element_type=f32) + b2_ref[l]
        x = x + ff

    # ---- final layernorm + LM head (vocab zero-padded to 128 lanes) ----
    h = _layernorm(x, lnfw_ref[...], lnfb_ref[...])
    logits_ref[...] = jnp.dot(_mxu(h), _mxu(wlm_ref[...]),
                              preferred_element_type=f32) + blm_ref[...]


def _spec(shape):
    n = len(shape)
    return pl.BlockSpec(shape, lambda i, _n=n: (0,) * _n)


def init_params(key):
    kit = iter(jax.random.split(key, 64))

    def nrm(shape):  # _init_weights: normal(mean=0, std=0.02); biases zero
        return 0.02 * jax.random.normal(next(kit), shape, dtype=jnp.float32)

    params = {
        "tok_emb": nrm((VOCAB_SIZE, N_EMBD)),
        "pos_emb": nrm((BLOCK_SIZE, N_EMBD)),
        "blocks": [],
        "lnf_w": jnp.ones((1, N_EMBD), jnp.float32),
        "lnf_b": jnp.zeros((1, N_EMBD), jnp.float32),
        "wlm": nrm((N_EMBD, VOCAB_SIZE)),
        "blm": jnp.zeros((1, VOCAB_SIZE), jnp.float32),
    }
    for _ in range(N_LAYER):
        params["blocks"].append({
            "ln1_w": jnp.ones((1, N_EMBD), jnp.float32),
            "ln1_b": jnp.zeros((1, N_EMBD), jnp.float32),
            # per-head k/q/v Linears (bias=False) stacked along the output dim:
            # columns [h*HS:(h+1)*HS] belong to head h.
            "wq": nrm((N_EMBD, N_EMBD)),
            "wk": nrm((N_EMBD, N_EMBD)),
            "wv": nrm((N_EMBD, N_EMBD)),
            "wproj": nrm((N_EMBD, N_EMBD)),
            "bproj": jnp.zeros((1, N_EMBD), jnp.float32),
            "ln2_w": jnp.ones((1, N_EMBD), jnp.float32),
            "ln2_b": jnp.zeros((1, N_EMBD), jnp.float32),
            "w1": nrm((N_EMBD, 4 * N_EMBD)),
            "b1": jnp.zeros((1, 4 * N_EMBD), jnp.float32),
            "w2": nrm((4 * N_EMBD, N_EMBD)),
            "b2": jnp.zeros((1, N_EMBD), jnp.float32),
        })
    return params


def pack_params(params):
    """One-time wrapper-side repack: per-head weight views + per-layer stacking
    so the fused kernel sees layer-indexed, head-batched slabs."""
    C, H, HS = N_EMBD, N_HEAD, HEAD_SIZE

    def per_head(w):            # (C, H*HS) cols grouped by head -> (H, C, HS)
        return w.reshape(C, H, HS).transpose(1, 0, 2)

    def qkv_slab(blk):          # (H, C, 3*HS): per head the columns are [q|k|v]
        return jnp.concatenate(
            [per_head(blk["wq"]), per_head(blk["wk"]), per_head(blk["wv"])],
            axis=-1)

    blocks = params["blocks"]
    stk = lambda key: jnp.stack([blk[key] for blk in blocks])
    return {
        "tok_emb": params["tok_emb"], "pos_emb": params["pos_emb"],
        "ln1_w": stk("ln1_w"), "ln1_b": stk("ln1_b"),
        "wqkv": jnp.stack([qkv_slab(blk) for blk in blocks]),   # (L, H, C, 3*HS)
        "wproj": jnp.stack([blk["wproj"].reshape(H, HS, C) for blk in blocks]),
        "bproj": stk("bproj"),
        "ln2_w": stk("ln2_w"), "ln2_b": stk("ln2_b"),
        "w1": stk("w1"), "b1": stk("b1"), "w2": stk("w2"), "b2": stk("b2"),
        "lnf_w": params["lnf_w"], "lnf_b": params["lnf_b"],
        # zero-pad the vocab dim to a multiple of 128 -> lane-dense logits store
        "wlm": jnp.pad(params["wlm"], ((0, 0), (0, VOCAB_PAD - VOCAB_SIZE))),
        "blm": jnp.pad(params["blm"], ((0, 0), (0, VOCAB_PAD - VOCAB_SIZE))),
    }


def ece457b_gpt_forward(packed, idx):
    """Forward pass of ECE457BGPT with targets=None -> (logits, None).
    Single fused pallas_call for all blocks + final LN + LM head."""
    B, T = idx.shape
    assert T <= BLOCK_SIZE
    N = B * T

    # TODO(synk): token-embedding gather could be folded into the kernel via a
    # scalar-prefetch row-gather BlockSpec; kept as XLA glue (lowest-value item).
    tok = jnp.take(packed["tok_emb"], idx, axis=0)              # (B, T, C)
    x2d = (tok + packed["pos_emb"][:T][None]).astype(jnp.float32).reshape(N, N_EMBD)

    kernel = functools.partial(fused_gpt_kernel, B=B, T=T)
    args = (x2d,
            packed["ln1_w"], packed["ln1_b"], packed["wqkv"], packed["wproj"],
            packed["bproj"], packed["ln2_w"], packed["ln2_b"],
            packed["w1"], packed["b1"], packed["w2"], packed["b2"],
            packed["lnf_w"], packed["lnf_b"], packed["wlm"], packed["blm"])
    out_shape = jax.ShapeDtypeStruct((N, VOCAB_PAD), jnp.float32)

    # TODO(synk): at the reference config (n_embd=384, block_size=256) replace
    # this whole-tensor single block with a (batch/seq)-tiled "parallel" grid
    # and set pltpu.CompilerParams(vmem_limit_bytes=...) against the 64 MiB
    # v7x / 16 MiB-default v5e VMEM budgets.
    logits_p = pl.pallas_call(
        kernel,
        out_shape=out_shape,
        grid=(1,),
        in_specs=[_spec(a.shape) for a in args],
        out_specs=_spec(out_shape.shape),
        compiler_params=pltpu.CompilerParams(
            dimension_semantics=("arbitrary",)),
    )(*args)

    logits = logits_p[:, :VOCAB_SIZE].reshape(B, T, VOCAB_SIZE)
    return logits, None


if __name__ == "__main__":
    key = jax.random.PRNGKey(0)
    pkey, dkey = jax.random.split(key)
    params = init_params(pkey)
    packed = pack_params(params)        # one-time layout repack (wrapper-side)

    B, T = 2, 8
    idx = jax.random.randint(dkey, (B, T), 0, VOCAB_SIZE, dtype=jnp.int32)

    logits, loss = jax.jit(ece457b_gpt_forward)(packed, idx)
    jax.block_until_ready(logits)
    assert logits.shape == (B, T, VOCAB_SIZE) and loss is None
    print("KERNEL_OK")
</pallas_src>

<mosaic_0001>
module attributes {stable_mosaic.version = 11 : i64} {
  func.func @fused_gpt_kernel(%arg0: i32, %arg1: memref<16x32xf32, #tpu.memory_space<vmem>>, %arg2: memref<2x1x32xf32, #tpu.memory_space<vmem>>, %arg3: memref<2x1x32xf32, #tpu.memory_space<vmem>>, %arg4: memref<2x4x32x24xf32, #tpu.memory_space<vmem>>, %arg5: memref<2x4x8x32xf32, #tpu.memory_space<vmem>>, %arg6: memref<2x1x32xf32, #tpu.memory_space<vmem>>, %arg7: memref<2x1x32xf32, #tpu.memory_space<vmem>>, %arg8: memref<2x1x32xf32, #tpu.memory_space<vmem>>, %arg9: memref<2x32x128xf32, #tpu.memory_space<vmem>>, %arg10: memref<2x1x128xf32, #tpu.memory_space<vmem>>, %arg11: memref<2x128x32xf32, #tpu.memory_space<vmem>>, %arg12: memref<2x1x32xf32, #tpu.memory_space<vmem>>, %arg13: memref<1x32xf32, #tpu.memory_space<vmem>>, %arg14: memref<1x32xf32, #tpu.memory_space<vmem>>, %arg15: memref<32x128xf32, #tpu.memory_space<vmem>>, %arg16: memref<1x128xf32, #tpu.memory_space<vmem>>, %arg17: memref<16x128xf32, #tpu.memory_space<vmem>>) attributes {dimension_semantics = [#tpu.dimension_semantics<arbitrary>], iteration_bounds = array<i64: 1>, scalar_prefetch = 0 : i64, scratch_operands = 0 : i64, tpu.core_type = #tpu.core_type<tc>, window_params = [{pipeline_mode = #tpu.pipeline_mode<synchronous>, transform_indices = @transform_0, window_bounds = array<i64: 16, 32>}, {pipeline_mode = #tpu.pipeline_mode<synchronous>, transform_indices = @transform_1, window_bounds = array<i64: 2, 1, 32>}, {pipeline_mode = #tpu.pipeline_mode<synchronous>, transform_indices = @transform_2, window_bounds = array<i64: 2, 1, 32>}, {pipeline_mode = #tpu.pipeline_mode<synchronous>, transform_indices = @transform_3, window_bounds = array<i64: 2, 4, 32, 24>}, {pipeline_mode = #tpu.pipeline_mode<synchronous>, transform_indices = @transform_4, window_bounds = array<i64: 2, 4, 8, 32>}, {pipeline_mode = #tpu.pipeline_mode<synchronous>, transform_indices = @transform_5, window_bounds = array<i64: 2, 1, 32>}, {pipeline_mode = #tpu.pipeline_mode<synchronous>, transform_indices = @transform_6, window_bounds = array<i64: 2, 1, 32>}, {pipeline_mode = #tpu.pipeline_mode<synchronous>, transform_indices = @transform_7, window_bounds = array<i64: 2, 1, 32>}, {pipeline_mode = #tpu.pipeline_mode<synchronous>, transform_indices = @transform_8, window_bounds = array<i64: 2, 32, 128>}, {pipeline_mode = #tpu.pipeline_mode<synchronous>, transform_indices = @transform_9, window_bounds = array<i64: 2, 1, 128>}, {pipeline_mode = #tpu.pipeline_mode<synchronous>, transform_indices = @transform_10, window_bounds = array<i64: 2, 128, 32>}, {pipeline_mode = #tpu.pipeline_mode<synchronous>, transform_indices = @transform_11, window_bounds = array<i64: 2, 1, 32>}, {pipeline_mode = #tpu.pipeline_mode<synchronous>, transform_indices = @transform_12, window_bounds = array<i64: 1, 32>}, {pipeline_mode = #tpu.pipeline_mode<synchronous>, transform_indices = @transform_13, window_bounds = array<i64: 1, 32>}, {pipeline_mode = #tpu.pipeline_mode<synchronous>, transform_indices = @transform_14, window_bounds = array<i64: 32, 128>}, {pipeline_mode = #tpu.pipeline_mode<synchronous>, transform_indices = @transform_15, window_bounds = array<i64: 1, 128>}, {pipeline_mode = #tpu.pipeline_mode<synchronous>, transform_indices = @transform_16, window_bounds = array<i64: 16, 128>}]} {
    %0 = tpu.iota {dimensions = array<i32: 0>} : vector<8x8xi32>
    %1 = tpu.iota {dimensions = array<i32: 1>} : vector<8x8xi32>
    %2 = arith.cmpi sge, %0, %1 : vector<8x8xi32>
    %c0 = arith.constant 0 : index
    %c0_0 = arith.constant 0 : index
    %3 = vector.load %arg1[%c0, %c0_0] : memref<16x32xf32, #tpu.memory_space<vmem>>, vector<16x32xf32>
    %c0_1 = arith.constant 0 : index
    %c0_2 = arith.constant 0 : index
    %c0_3 = arith.constant 0 : index
    %4 = vector.load %arg2[%c0_1, %c0_2, %c0_3] : memref<2x1x32xf32, #tpu.memory_space<vmem>>, vector<1x1x32xf32>
    %5 = vector.shape_cast %4 : vector<1x1x32xf32> to vector<1x32xf32>
    %c0_4 = arith.constant 0 : index
    %c0_5 = arith.constant 0 : index
    %c0_6 = arith.constant 0 : index
    %6 = vector.load %arg3[%c0_4, %c0_5, %c0_6] : memref<2x1x32xf32, #tpu.memory_space<vmem>>, vector<1x1x32xf32>
    %7 = vector.shape_cast %6 : vector<1x1x32xf32> to vector<1x32xf32>
    %cst = arith.constant dense<0.000000e+00> : vector<16xf32>
    %8 = vector.multi_reduction <add>, %3, %cst [1] : vector<16x32xf32> to vector<16xf32>
    %9 = vector.shape_cast %8 : vector<16xf32> to vector<16x1xf32>
    %cst_7 = arith.constant 3.200000e+01 : f32
    %10 = vector.broadcast %cst_7 : f32 to vector<16x1xf32>
    %11 = arith.divf %9, %10 : vector<16x1xf32>
    %12 = vector.broadcast %11 : vector<16x1xf32> to vector<16x32xf32>
    %13 = arith.subf %3, %12 : vector<16x32xf32>
    %14 = arith.mulf %13, %13 : vector<16x32xf32>
    %cst_8 = arith.constant dense<0.000000e+00> : vector<16xf32>
    %15 = vector.multi_reduction <add>, %14, %cst_8 [1] : vector<16x32xf32> to vector<16xf32>
    %16 = vector.shape_cast %15 : vector<16xf32> to vector<16x1xf32>
    %cst_9 = arith.constant 3.200000e+01 : f32
    %17 = vector.broadcast %cst_9 : f32 to vector<16x1xf32>
    %18 = arith.divf %16, %17 : vector<16x1xf32>
    %19 = vector.broadcast %11 : vector<16x1xf32> to vector<16x32xf32>
    %20 = arith.subf %3, %19 : vector<16x32xf32>
    %cst_10 = arith.constant 9.99999974E-6 : f32
    %21 = vector.broadcast %cst_10 : f32 to vector<16x1xf32>
    %22 = arith.addf %18, %21 : vector<16x1xf32>
    %23 = math.rsqrt %22 : vector<16x1xf32>
    %24 = vector.broadcast %23 : vector<16x1xf32> to vector<16x32xf32>
    %25 = arith.mulf %20, %24 : vector<16x32xf32>
    %26 = vector.broadcast %5 : vector<1x32xf32> to vector<16x32xf32>
    %27 = arith.mulf %25, %26 : vector<16x32xf32>
    %28 = vector.broadcast %7 : vector<1x32xf32> to vector<16x32xf32>
    %29 = arith.addf %27, %28 : vector<16x32xf32>
    %30 = vector.shape_cast %29 : vector<16x32xf32> to vector<1x16x32xf32>
    %31 = vector.shape_cast %30 : vector<1x16x32xf32> to vector<1x16x32xf32>
    %32 = vector.broadcast %31 : vector<1x16x32xf32> to vector<4x16x32xf32>
    %c0_11 = arith.constant 0 : index
    %c0_12 = arith.constant 0 : index
    %c0_13 = arith.constant 0 : index
    %c0_14 = arith.constant 0 : index
    %33 = vector.load %arg4[%c0_11, %c0_12, %c0_13, %c0_14] : memref<2x4x32x24xf32, #tpu.memory_space<vmem>>, vector<1x4x32x24xf32>
    %34 = vector.shape_cast %33 : vector<1x4x32x24xf32> to vector<4x32x24xf32>
    "tpu.trace_start"() <{level = 10 : i32, message = "hnc,hcd->hnd"}> : () -> ()
    %cst_15 = arith.constant dense<0.000000e+00> : vector<4x16x24xf32>
    %35 = tpu.matmul %32, %34, %cst_15 {dimension_numbers = #tpu.dot_dimension_numbers<[2], [1], [1], [2], [0, 0, 0, 1, 1, 2], [0], [0]>} : vector<4x16x32xf32>, vector<4x32x24xf32>, vector<4x16x24xf32> -> vector<4x16x24xf32>
    "tpu.trace_stop"() : () -> ()
    %36 = vector.extract_strided_slice %35 {offsets = [0, 0, 0], sizes = [4, 16, 8], strides = [1, 1, 1]} : vector<4x16x24xf32> to vector<4x16x8xf32>
    %cst_16 = arith.constant 0.707106769 : f32
    %37 = vector.broadcast %cst_16 : f32 to vector<4x16x8xf32>
    %38 = arith.mulf %36, %37 : vector<4x16x8xf32>
    %39 = vector.shape_cast %38 : vector<4x16x8xf32> to vector<8x8x8xf32>
    %40 = vector.extract_strided_slice %35 {offsets = [0, 0, 8], sizes = [4, 16, 8], strides = [1, 1, 1]} : vector<4x16x24xf32> to vector<4x16x8xf32>
    %41 = vector.shape_cast %40 : vector<4x16x8xf32> to vector<8x8x8xf32>
    %42 = vector.extract_strided_slice %35 {offsets = [0, 0, 16], sizes = [4, 16, 8], strides = [1, 1, 1]} : vector<4x16x24xf32> to vector<4x16x8xf32>
    %43 = vector.shape_cast %42 : vector<4x16x8xf32> to vector<8x8x8xf32>
    "tpu.trace_start"() <{level = 10 : i32, message = "ntd,nsd->nts"}> : () -> ()
    %cst_17 = arith.constant dense<0.000000e+00> : vector<8x8x8xf32>
    %44 = tpu.matmul %39, %41, %cst_17 {dimension_numbers = #tpu.dot_dimension_numbers<[2], [2], [1], [1], [0, 0, 0, 1, 1, 1], [0], [0]>} : vector<8x8x8xf32>, vector<8x8x8xf32>, vector<8x8x8xf32> -> vector<8x8x8xf32>
    "tpu.trace_stop"() : () -> ()
    %45 = vector.shape_cast %2 : vector<8x8xi1> to vector<1x8x8xi1>
    %cst_18 = arith.constant 0xFF800000 : f32
    %46 = vector.shape_cast %45 : vector<1x8x8xi1> to vector<1x8x8xi1>
    %47 = vector.broadcast %46 : vector<1x8x8xi1> to vector<8x8x8xi1>
    %48 = vector.broadcast %cst_18 : f32 to vector<8x8x8xf32>
    %49 = arith.select %47, %44, %48 : vector<8x8x8xi1>, vector<8x8x8xf32>
    %50 = vector.shape_cast %49 : vector<8x8x8xf32> to vector<4x2x8x8xf32>
    %cst_19 = arith.constant dense<0xFF800000> : vector<4x8x8xf32>
    %51 = vector.multi_reduction <maximumf>, %50, %cst_19 [1] : vector<4x2x8x8xf32> to vector<4x8x8xf32>
    %52 = vector.shape_cast %51 : vector<4x8x8xf32> to vector<4x1x8x8xf32>
    %53 = vector.broadcast %52 : vector<4x1x8x8xf32> to vector<4x2x8x8xf32>
    %54 = arith.subf %50, %53 : vector<4x2x8x8xf32>
    %55 = math.exp %54 : vector<4x2x8x8xf32>
    %cst_20 = arith.constant dense<0.000000e+00> : vector<4x8x8xf32>
    %56 = vector.multi_reduction <add>, %55, %cst_20 [1] : vector<4x2x8x8xf32> to vector<4x8x8xf32>
    %57 = vector.shape_cast %56 : vector<4x8x8xf32> to vector<4x1x8x8xf32>
    %58 = tpu.reciprocal %57 {approx = true} : vector<4x1x8x8xf32> -> vector<4x1x8x8xf32>
    %59 = vector.broadcast %58 : vector<4x1x8x8xf32> to vector<4x2x8x8xf32>
    %60 = arith.mulf %55, %59 : vector<4x2x8x8xf32>
    %61 = vector.shape_cast %60 : vector<4x2x8x8xf32> to vector<8x8x8xf32>
    "tpu.trace_start"() <{level = 10 : i32, message = "nts,nsd->ntd"}> : () -> ()
    %cst_21 = arith.constant dense<0.000000e+00> : vector<8x8x8xf32>
    %62 = tpu.matmul %61, %43, %cst_21 {dimension_numbers = #tpu.dot_dimension_numbers<[2], [1], [1], [2], [0, 0, 0, 1, 1, 2], [0], [0]>} : vector<8x8x8xf32>, vector<8x8x8xf32>, vector<8x8x8xf32> -> vector<8x8x8xf32>
    "tpu.trace_stop"() : () -> ()
    %63 = vector.shape_cast %62 : vector<8x8x8xf32> to vector<4x16x8xf32>
    %c0_22 = arith.constant 0 : index
    %c0_23 = arith.constant 0 : index
    %c0_24 = arith.constant 0 : index
    %c0_25 = arith.constant 0 : index
    %64 = vector.load %arg5[%c0_22, %c0_23, %c0_24, %c0_25] : memref<2x4x8x32xf32, #tpu.memory_space<vmem>>, vector<1x4x8x32xf32>
    %65 = vector.shape_cast %64 : vector<1x4x8x32xf32> to vector<4x8x32xf32>
    "tpu.trace_start"() <{level = 10 : i32, message = "hnd,hdj->hnj"}> : () -> ()
    %cst_26 = arith.constant dense<0.000000e+00> : vector<4x16x32xf32>
    %66 = tpu.matmul %63, %65, %cst_26 {dimension_numbers = #tpu.dot_dimension_numbers<[2], [1], [1], [2], [0, 0, 0, 1, 1, 2], [0], [0]>} : vector<4x16x8xf32>, vector<4x8x32xf32>, vector<4x16x32xf32> -> vector<4x16x32xf32>
    "tpu.trace_stop"() : () -> ()
    %cst_27 = arith.constant dense<0.000000e+00> : vector<16x32xf32>
    %67 = vector.multi_reduction <add>, %66, %cst_27 [0] : vector<4x16x32xf32> to vector<16x32xf32>
    %68 = arith.addf %3, %67 : vector<16x32xf32>
    %c0_28 = arith.constant 0 : index
    %c0_29 = arith.constant 0 : index
    %c0_30 = arith.constant 0 : index
    %69 = vector.load %arg6[%c0_28, %c0_29, %c0_30] : memref<2x1x32xf32, #tpu.memory_space<vmem>>, vector<1x1x32xf32>
    %70 = vector.shape_cast %69 : vector<1x1x32xf32> to vector<1x32xf32>
    %71 = vector.broadcast %70 : vector<1x32xf32> to vector<16x32xf32>
    %72 = arith.addf %68, %71 : vector<16x32xf32>
    %c0_31 = arith.constant 0 : index
    %c0_32 = arith.constant 0 : index
    %c0_33 = arith.constant 0 : index
    %73 = vector.load %arg7[%c0_31, %c0_32, %c0_33] : memref<2x1x32xf32, #tpu.memory_space<vmem>>, vector<1x1x32xf32>
    %74 = vector.shape_cast %73 : vector<1x1x32xf32> to vector<1x32xf32>
    %c0_34 = arith.constant 0 : index
    %c0_35 = arith.constant 0 : index
    %c0_36 = arith.constant 0 : index
    %75 = vector.load %arg8[%c0_34, %c0_35, %c0_36] : memref<2x1x32xf32, #tpu.memory_space<vmem>>, vector<1x1x32xf32>
    %76 = vector.shape_cast %75 : vector<1x1x32xf32> to vector<1x32xf32>
    %cst_37 = arith.constant dense<0.000000e+00> : vector<16xf32>
    %77 = vector.multi_reduction <add>, %72, %cst_37 [1] : vector<16x32xf32> to vector<16xf32>
    %78 = vector.shape_cast %77 : vector<16xf32> to vector<16x1xf32>
    %cst_38 = arith.constant 3.200000e+01 : f32
    %79 = vector.broadcast %cst_38 : f32 to vector<16x1xf32>
    %80 = arith.divf %78, %79 : vector<16x1xf32>
    %81 = vector.broadcast %80 : vector<16x1xf32> to vector<16x32xf32>
    %82 = arith.subf %72, %81 : vector<16x32xf32>
    %83 = arith.mulf %82, %82 : vector<16x32xf32>
    %cst_39 = arith.constant dense<0.000000e+00> : vector<16xf32>
    %84 = vector.multi_reduction <add>, %83, %cst_39 [1] : vector<16x32xf32> to vector<16xf32>
    %85 = vector.shape_cast %84 : vector<16xf32> to vector<16x1xf32>
    %cst_40 = arith.constant 3.200000e+01 : f32
    %86 = vector.broadcast %cst_40 : f32 to vector<16x1xf32>
    %87 = arith.divf %85, %86 : vector<16x1xf32>
    %88 = vector.broadcast %80 : vector<16x1xf32> to vector<16x32xf32>
    %89 = arith.subf %72, %88 : vector<16x32xf32>
    %cst_41 = arith.constant 9.99999974E-6 : f32
    %90 = vector.broadcast %cst_41 : f32 to vector<16x1xf32>
    %91 = arith.addf %87, %90 : vector<16x1xf32>
    %92 = math.rsqrt %91 : vector<16x1xf32>
    %93 = vector.broadcast %92 : vector<16x1xf32> to vector<16x32xf32>
    %94 = arith.mulf %89, %93 : vector<16x32xf32>
    %95 = vector.broadcast %74 : vector<1x32xf32> to vector<16x32xf32>
    %96 = arith.mulf %94, %95 : vector<16x32xf32>
    %97 = vector.broadcast %76 : vector<1x32xf32> to vector<16x32xf32>
    %98 = arith.addf %96, %97 : vector<16x32xf32>
    %c0_42 = arith.constant 0 : index
    %c0_43 = arith.constant 0 : index
    %c0_44 = arith.constant 0 : index
    %99 = vector.load %arg9[%c0_42, %c0_43, %c0_44] : memref<2x32x128xf32, #tpu.memory_space<vmem>>, vector<1x32x128xf32>
    %100 = vector.shape_cast %99 : vector<1x32x128xf32> to vector<32x128xf32>
    %cst_45 = arith.constant dense<0.000000e+00> : vector<16x128xf32>
    %101 = tpu.matmul %98, %100, %cst_45 {dimension_numbers = #tpu.dot_dimension_numbers<[1], [0], [0], [1], [0, 0, 1, 1], [], []>} : vector<16x32xf32>, vector<32x128xf32>, vector<16x128xf32> -> vector<16x128xf32>
    %c0_46 = arith.constant 0 : index
    %c0_47 = arith.constant 0 : index
    %c0_48 = arith.constant 0 : index
    %102 = vector.load %arg10[%c0_46, %c0_47, %c0_48] : memref<2x1x128xf32, #tpu.memory_space<vmem>>, vector<1x1x128xf32>
    %103 = vector.shape_cast %102 : vector<1x1x128xf32> to vector<1x128xf32>
    %104 = vector.broadcast %103 : vector<1x128xf32> to vector<16x128xf32>
    %105 = arith.addf %101, %104 : vector<16x128xf32>
    %cst_49 = arith.constant 0.000000e+00 : f32
    %106 = vector.broadcast %cst_49 : f32 to vector<16x128xf32>
    %107 = arith.maximumf %105, %106 : vector<16x128xf32>
    %c0_50 = arith.constant 0 : index
    %c0_51 = arith.constant 0 : index
    %c0_52 = arith.constant 0 : index
    %108 = vector.load %arg11[%c0_50, %c0_51, %c0_52] : memref<2x128x32xf32, #tpu.memory_space<vmem>>, vector<1x128x32xf32>
    %109 = vector.shape_cast %108 : vector<1x128x32xf32> to vector<128x32xf32>
    %cst_53 = arith.constant dense<0.000000e+00> : vector<16x32xf32>
    %110 = tpu.matmul %107, %109, %cst_53 {dimension_numbers = #tpu.dot_dimension_numbers<[1], [0], [0], [1], [0, 0, 1, 1], [], []>} : vector<16x128xf32>, vector<128x32xf32>, vector<16x32xf32> -> vector<16x32xf32>
    %c0_54 = arith.constant 0 : index
    %c0_55 = arith.constant 0 : index
    %c0_56 = arith.constant 0 : index
    %111 = vector.load %arg12[%c0_54, %c0_55, %c0_56] : memref<2x1x32xf32, #tpu.memory_space<vmem>>, vector<1x1x32xf32>
    %112 = vector.shape_cast %111 : vector<1x1x32xf32> to vector<1x32xf32>
    %113 = vector.broadcast %112 : vector<1x32xf32> to vector<16x32xf32>
    %114 = arith.addf %110, %113 : vector<16x32xf32>
    %115 = arith.addf %72, %114 : vector<16x32xf32>
    %c1 = arith.constant 1 : index
    %c0_57 = arith.constant 0 : index
    %c0_58 = arith.constant 0 : index
    %116 = vector.load %arg2[%c1, %c0_57, %c0_58] : memref<2x1x32xf32, #tpu.memory_space<vmem>>, vector<1x1x32xf32>
    %117 = vector.shape_cast %116 : vector<1x1x32xf32> to vector<1x32xf32>
    %c1_59 = arith.constant 1 : index
    %c0_60 = arith.constant 0 : index
    %c0_61 = arith.constant 0 : index
    %118 = vector.load %arg3[%c1_59, %c0_60, %c0_61] : memref<2x1x32xf32, #tpu.memory_space<vmem>>, vector<1x1x32xf32>
    %119 = vector.shape_cast %118 : vector<1x1x32xf32> to vector<1x32xf32>
    %cst_62 = arith.constant dense<0.000000e+00> : vector<16xf32>
    %120 = vector.multi_reduction <add>, %115, %cst_62 [1] : vector<16x32xf32> to vector<16xf32>
    %121 = vector.shape_cast %120 : vector<16xf32> to vector<16x1xf32>
    %cst_63 = arith.constant 3.200000e+01 : f32
    %122 = vector.broadcast %cst_63 : f32 to vector<16x1xf32>
    %123 = arith.divf %121, %122 : vector<16x1xf32>
    %124 = vector.broadcast %123 : vector<16x1xf32> to vector<16x32xf32>
    %125 = arith.subf %115, %124 : vector<16x32xf32>
    %126 = arith.mulf %125, %125 : vector<16x32xf32>
    %cst_64 = arith.constant dense<0.000000e+00> : vector<16xf32>
    %127 = vector.multi_reduction <add>, %126, %cst_64 [1] : vector<16x32xf32> to vector<16xf32>
    %128 = vector.shape_cast %127 : vector<16xf32> to vector<16x1xf32>
    %cst_65 = arith.constant 3.200000e+01 : f32
    %129 = vector.broadcast %cst_65 : f32 to vector<16x1xf32>
    %130 = arith.divf %128, %129 : vector<16x1xf32>
    %131 = vector.broadcast %123 : vector<16x1xf32> to vector<16x32xf32>
    %132 = arith.subf %115, %131 : vector<16x32xf32>
    %cst_66 = arith.constant 9.99999974E-6 : f32
    %133 = vector.broadcast %cst_66 : f32 to vector<16x1xf32>
    %134 = arith.addf %130, %133 : vector<16x1xf32>
    %135 = math.rsqrt %134 : vector<16x1xf32>
    %136 = vector.broadcast %135 : vector<16x1xf32> to vector<16x32xf32>
    %137 = arith.mulf %132, %136 : vector<16x32xf32>
    %138 = vector.broadcast %117 : vector<1x32xf32> to vector<16x32xf32>
    %139 = arith.mulf %137, %138 : vector<16x32xf32>
    %140 = vector.broadcast %119 : vector<1x32xf32> to vector<16x32xf32>
    %141 = arith.addf %139, %140 : vector<16x32xf32>
    %142 = vector.shape_cast %141 : vector<16x32xf32> to vector<1x16x32xf32>
    %143 = vector.shape_cast %142 : vector<1x16x32xf32> to vector<1x16x32xf32>
    %144 = vector.broadcast %143 : vector<1x16x32xf32> to vector<4x16x32xf32>
    %c1_67 = arith.constant 1 : index
    %c0_68 = arith.constant 0 : index
    %c0_69 = arith.constant 0 : index
    %c0_70 = arith.constant 0 : index
    %145 = vector.load %arg4[%c1_67, %c0_68, %c0_69, %c0_70] : memref<2x4x32x24xf32, #tpu.memory_space<vmem>>, vector<1x4x32x24xf32>
    %146 = vector.shape_cast %145 : vector<1x4x32x24xf32> to vector<4x32x24xf32>
    "tpu.trace_start"() <{level = 10 : i32, message = "hnc,hcd->hnd"}> : () -> ()
    %cst_71 = arith.constant dense<0.000000e+00> : vector<4x16x24xf32>
    %147 = tpu.matmul %144, %146, %cst_71 {dimension_numbers = #tpu.dot_dimension_numbers<[2], [1], [1], [2], [0, 0, 0, 1, 1, 2], [0], [0]>} : vector<4x16x32xf32>, vector<4x32x24xf32>, vector<4x16x24xf32> -> vector<4x16x24xf32>
    "tpu.trace_stop"() : () -> ()
    %148 = vector.extract_strided_slice %147 {offsets = [0, 0, 0], sizes = [4, 16, 8], strides = [1, 1, 1]} : vector<4x16x24xf32> to vector<4x16x8xf32>
    %cst_72 = arith.constant 0.707106769 : f32
    %149 = vector.broadcast %cst_72 : f32 to vector<4x16x8xf32>
    %150 = arith.mulf %148, %149 : vector<4x16x8xf32>
    %151 = vector.shape_cast %150 : vector<4x16x8xf32> to vector<8x8x8xf32>
    %152 = vector.extract_strided_slice %147 {offsets = [0, 0, 8], sizes = [4, 16, 8], strides = [1, 1, 1]} : vector<4x16x24xf32> to vector<4x16x8xf32>
    %153 = vector.shape_cast %152 : vector<4x16x8xf32> to vector<8x8x8xf32>
    %154 = vector.extract_strided_slice %147 {offsets = [0, 0, 16], sizes = [4, 16, 8], strides = [1, 1, 1]} : vector<4x16x24xf32> to vector<4x16x8xf32>
    %155 = vector.shape_cast %154 : vector<4x16x8xf32> to vector<8x8x8xf32>
    "tpu.trace_start"() <{level = 10 : i32, message = "ntd,nsd->nts"}> : () -> ()
    %cst_73 = arith.constant dense<0.000000e+00> : vector<8x8x8xf32>
    %156 = tpu.matmul %151, %153, %cst_73 {dimension_numbers = #tpu.dot_dimension_numbers<[2], [2], [1], [1], [0, 0, 0, 1, 1, 1], [0], [0]>} : vector<8x8x8xf32>, vector<8x8x8xf32>, vector<8x8x8xf32> -> vector<8x8x8xf32>
    "tpu.trace_stop"() : () -> ()
    %157 = vector.shape_cast %2 : vector<8x8xi1> to vector<1x8x8xi1>
    %cst_74 = arith.constant 0xFF800000 : f32
    %158 = vector.shape_cast %157 : vector<1x8x8xi1> to vector<1x8x8xi1>
    %159 = vector.broadcast %158 : vector<1x8x8xi1> to vector<8x8x8xi1>
    %160 = vector.broadcast %cst_74 : f32 to vector<8x8x8xf32>
    %161 = arith.select %159, %156, %160 : vector<8x8x8xi1>, vector<8x8x8xf32>
    %162 = vector.shape_cast %161 : vector<8x8x8xf32> to vector<4x2x8x8xf32>
    %cst_75 = arith.constant dense<0xFF800000> : vector<4x8x8xf32>
    %163 = vector.multi_reduction <maximumf>, %162, %cst_75 [1] : vector<4x2x8x8xf32> to vector<4x8x8xf32>
    %164 = vector.shape_cast %163 : vector<4x8x8xf32> to vector<4x1x8x8xf32>
    %165 = vector.broadcast %164 : vector<4x1x8x8xf32> to vector<4x2x8x8xf32>
    %166 = arith.subf %162, %165 : vector<4x2x8x8xf32>
    %167 = math.exp %166 : vector<4x2x8x8xf32>
    %cst_76 = arith.constant dense<0.000000e+00> : vector<4x8x8xf32>
    %168 = vector.multi_reduction <add>, %167, %cst_76 [1] : vector<4x2x8x8xf32> to vector<4x8x8xf32>
    %169 = vector.shape_cast %168 : vector<4x8x8xf32> to vector<4x1x8x8xf32>
    %170 = tpu.reciprocal %169 {approx = true} : vector<4x1x8x8xf32> -> vector<4x1x8x8xf32>
    %171 = vector.broadcast %170 : vector<4x1x8x8xf32> to vector<4x2x8x8xf32>
    %172 = arith.mulf %167, %171 : vector<4x2x8x8xf32>
    %173 = vector.shape_cast %172 : vector<4x2x8x8xf32> to vector<8x8x8xf32>
    "tpu.trace_start"() <{level = 10 : i32, message = "nts,nsd->ntd"}> : () -> ()
    %cst_77 = arith.constant dense<0.000000e+00> : vector<8x8x8xf32>
    %174 = tpu.matmul %173, %155, %cst_77 {dimension_numbers = #tpu.dot_dimension_numbers<[2], [1], [1], [2], [0, 0, 0, 1, 1, 2], [0], [0]>} : vector<8x8x8xf32>, vector<8x8x8xf32>, vector<8x8x8xf32> -> vector<8x8x8xf32>
    "tpu.trace_stop"() : () -> ()
    %175 = vector.shape_cast %174 : vector<8x8x8xf32> to vector<4x16x8xf32>
    %c1_78 = arith.constant 1 : index
    %c0_79 = arith.constant 0 : index
    %c0_80 = arith.constant 0 : index
    %c0_81 = arith.constant 0 : index
    %176 = vector.load %arg5[%c1_78, %c0_79, %c0_80, %c0_81] : memref<2x4x8x32xf32, #tpu.memory_space<vmem>>, vector<1x4x8x32xf32>
    %177 = vector.shape_cast %176 : vector<1x4x8x32xf32> to vector<4x8x32xf32>
    "tpu.trace_start"() <{level = 10 : i32, message = "hnd,hdj->hnj"}> : () -> ()
    %cst_82 = arith.constant dense<0.000000e+00> : vector<4x16x32xf32>
    %178 = tpu.matmul %175, %177, %cst_82 {dimension_numbers = #tpu.dot_dimension_numbers<[2], [1], [1], [2], [0, 0, 0, 1, 1, 2], [0], [0]>} : vector<4x16x8xf32>, vector<4x8x32xf32>, vector<4x16x32xf32> -> vector<4x16x32xf32>
    "tpu.trace_stop"() : () -> ()
    %cst_83 = arith.constant dense<0.000000e+00> : vector<16x32xf32>
    %179 = vector.multi_reduction <add>, %178, %cst_83 [0] : vector<4x16x32xf32> to vector<16x32xf32>
    %180 = arith.addf %115, %179 : vector<16x32xf32>
    %c1_84 = arith.constant 1 : index
    %c0_85 = arith.constant 0 : index
    %c0_86 = arith.constant 0 : index
    %181 = vector.load %arg6[%c1_84, %c0_85, %c0_86] : memref<2x1x32xf32, #tpu.memory_space<vmem>>, vector<1x1x32xf32>
    %182 = vector.shape_cast %181 : vector<1x1x32xf32> to vector<1x32xf32>
    %183 = vector.broadcast %182 : vector<1x32xf32> to vector<16x32xf32>
    %184 = arith.addf %180, %183 : vector<16x32xf32>
    %c1_87 = arith.constant 1 : index
    %c0_88 = arith.constant 0 : index
    %c0_89 = arith.constant 0 : index
    %185 = vector.load %arg7[%c1_87, %c0_88, %c0_89] : memref<2x1x32xf32, #tpu.memory_space<vmem>>, vector<1x1x32xf32>
    %186 = vector.shape_cast %185 : vector<1x1x32xf32> to vector<1x32xf32>
    %c1_90 = arith.constant 1 : index
    %c0_91 = arith.constant 0 : index
    %c0_92 = arith.constant 0 : index
    %187 = vector.load %arg8[%c1_90, %c0_91, %c0_92] : memref<2x1x32xf32, #tpu.memory_space<vmem>>, vector<1x1x32xf32>
    %188 = vector.shape_cast %187 : vector<1x1x32xf32> to vector<1x32xf32>
    %cst_93 = arith.constant dense<0.000000e+00> : vector<16xf32>
    %189 = vector.multi_reduction <add>, %184, %cst_93 [1] : vector<16x32xf32> to vector<16xf32>
    %190 = vector.shape_cast %189 : vector<16xf32> to vector<16x1xf32>
    %cst_94 = arith.constant 3.200000e+01 : f32
    %191 = vector.broadcast %cst_94 : f32 to vector<16x1xf32>
    %192 = arith.divf %190, %191 : vector<16x1xf32>
    %193 = vector.broadcast %192 : vector<16x1xf32> to vector<16x32xf32>
    %194 = arith.subf %184, %193 : vector<16x32xf32>
    %195 = arith.mulf %194, %194 : vector<16x32xf32>
    %cst_95 = arith.constant dense<0.000000e+00> : vector<16xf32>
    %196 = vector.multi_reduction <add>, %195, %cst_95 [1] : vector<16x32xf32> to vector<16xf32>
    %197 = vector.shape_cast %196 : vector<16xf32> to vector<16x1xf32>
    %cst_96 = arith.constant 3.200000e+01 : f32
    %198 = vector.broadcast %cst_96 : f32 to vector<16x1xf32>
    %199 = arith.divf %197, %198 : vector<16x1xf32>
    %200 = vector.broadcast %192 : vector<16x1xf32> to vector<16x32xf32>
    %201 = arith.subf %184, %200 : vector<16x32xf32>
    %cst_97 = arith.constant 9.99999974E-6 : f32
    %202 = vector.broadcast %cst_97 : f32 to vector<16x1xf32>
    %203 = arith.addf %199, %202 : vector<16x1xf32>
    %204 = math.rsqrt %203 : vector<16x1xf32>
    %205 = vector.broadcast %204 : vector<16x1xf32> to vector<16x32xf32>
    %206 = arith.mulf %201, %205 : vector<16x32xf32>
    %207 = vector.broadcast %186 : vector<1x32xf32> to vector<16x32xf32>
    %208 = arith.mulf %206, %207 : vector<16x32xf32>
    %209 = vector.broadcast %188 : vector<1x32xf32> to vector<16x32xf32>
    %210 = arith.addf %208, %209 : vector<16x32xf32>
    %c1_98 = arith.constant 1 : index
    %c0_99 = arith.constant 0 : index
    %c0_100 = arith.constant 0 : index
    %211 = vector.load %arg9[%c1_98, %c0_99, %c0_100] : memref<2x32x128xf32, #tpu.memory_space<vmem>>, vector<1x32x128xf32>
    %212 = vector.shape_cast %211 : vector<1x32x128xf32> to vector<32x128xf32>
    %cst_101 = arith.constant dense<0.000000e+00> : vector<16x128xf32>
    %213 = tpu.matmul %210, %212, %cst_101 {dimension_numbers = #tpu.dot_dimension_numbers<[1], [0], [0], [1], [0, 0, 1, 1], [], []>} : vector<16x32xf32>, vector<32x128xf32>, vector<16x128xf32> -> vector<16x128xf32>
    %c1_102 = arith.constant 1 : index
    %c0_103 = arith.constant 0 : index
    %c0_104 = arith.constant 0 : index
    %214 = vector.load %arg10[%c1_102, %c0_103, %c0_104] : memref<2x1x128xf32, #tpu.memory_space<vmem>>, vector<1x1x128xf32>
    %215 = vector.shape_cast %214 : vector<1x1x128xf32> to vector<1x128xf32>
    %216 = vector.broadcast %215 : vector<1x128xf32> to vector<16x128xf32>
    %217 = arith.addf %213, %216 : vector<16x128xf32>
    %cst_105 = arith.constant 0.000000e+00 : f32
    %218 = vector.broadcast %cst_105 : f32 to vector<16x128xf32>
    %219 = arith.maximumf %217, %218 : vector<16x128xf32>
    %c1_106 = arith.constant 1 : index
    %c0_107 = arith.constant 0 : index
    %c0_108 = arith.constant 0 : index
    %220 = vector.load %arg11[%c1_106, %c0_107, %c0_108] : memref<2x128x32xf32, #tpu.memory_space<vmem>>, vector<1x128x32xf32>
    %221 = vector.shape_cast %220 : vector<1x128x32xf32> to vector<128x32xf32>
    %cst_109 = arith.constant dense<0.000000e+00> : vector<16x32xf32>
    %222 = tpu.matmul %219, %221, %cst_109 {dimension_numbers = #tpu.dot_dimension_numbers<[1], [0], [0], [1], [0, 0, 1, 1], [], []>} : vector<16x128xf32>, vector<128x32xf32>, vector<16x32xf32> -> vector<16x32xf32>
    %c1_110 = arith.constant 1 : index
    %c0_111 = arith.constant 0 : index
    %c0_112 = arith.constant 0 : index
    %223 = vector.load %arg12[%c1_110, %c0_111, %c0_112] : memref<2x1x32xf32, #tpu.memory_space<vmem>>, vector<1x1x32xf32>
    %224 = vector.shape_cast %223 : vector<1x1x32xf32> to vector<1x32xf32>
    %225 = vector.broadcast %224 : vector<1x32xf32> to vector<16x32xf32>
    %226 = arith.addf %222, %225 : vector<16x32xf32>
    %227 = arith.addf %184, %226 : vector<16x32xf32>
    %c0_113 = arith.constant 0 : index
    %c0_114 = arith.constant 0 : index
    %228 = vector.load %arg13[%c0_113, %c0_114] : memref<1x32xf32, #tpu.memory_space<vmem>>, vector<1x32xf32>
    %c0_115 = arith.constant 0 : index
    %c0_116 = arith.constant 0 : index
    %229 = vector.load %arg14[%c0_115, %c0_116] : memref<1x32xf32, #tpu.memory_space<vmem>>, vector<1x32xf32>
    %cst_117 = arith.constant dense<0.000000e+00> : vector<16xf32>
    %230 = vector.multi_reduction <add>, %227, %cst_117 [1] : vector<16x32xf32> to vector<16xf32>
    %231 = vector.shape_cast %230 : vector<16xf32> to vector<16x1xf32>
    %cst_118 = arith.constant 3.200000e+01 : f32
    %232 = vector.broadcast %cst_118 : f32 to vector<16x1xf32>
    %233 = arith.divf %231, %232 : vector<16x1xf32>
    %234 = vector.broadcast %233 : vector<16x1xf32> to vector<16x32xf32>
    %235 = arith.subf %227, %234 : vector<16x32xf32>
    %236 = arith.mulf %235, %235 : vector<16x32xf32>
    %cst_119 = arith.constant dense<0.000000e+00> : vector<16xf32>
    %237 = vector.multi_reduction <add>, %236, %cst_119 [1] : vector<16x32xf32> to vector<16xf32>
    %238 = vector.shape_cast %237 : vector<16xf32> to vector<16x1xf32>
    %cst_120 = arith.constant 3.200000e+01 : f32
    %239 = vector.broadcast %cst_120 : f32 to vector<16x1xf32>
    %240 = arith.divf %238, %239 : vector<16x1xf32>
    %241 = vector.broadcast %233 : vector<16x1xf32> to vector<16x32xf32>
    %242 = arith.subf %227, %241 : vector<16x32xf32>
    %cst_121 = arith.constant 9.99999974E-6 : f32
    %243 = vector.broadcast %cst_121 : f32 to vector<16x1xf32>
    %244 = arith.addf %240, %243 : vector<16x1xf32>
    %245 = math.rsqrt %244 : vector<16x1xf32>
    %246 = vector.broadcast %245 : vector<16x1xf32> to vector<16x32xf32>
    %247 = arith.mulf %242, %246 : vector<16x32xf32>
    %248 = vector.broadcast %228 : vector<1x32xf32> to vector<16x32xf32>
    %249 = arith.mulf %247, %248 : vector<16x32xf32>
    %250 = vector.broadcast %229 : vector<1x32xf32> to vector<16x32xf32>
    %251 = arith.addf %249, %250 : vector<16x32xf32>
    %c0_122 = arith.constant 0 : index
    %c0_123 = arith.constant 0 : index
    %252 = vector.load %arg15[%c0_122, %c0_123] : memref<32x128xf32, #tpu.memory_space<vmem>>, vector<32x128xf32>
    %cst_124 = arith.constant dense<0.000000e+00> : vector<16x128xf32>
    %253 = tpu.matmul %251, %252, %cst_124 {dimension_numbers = #tpu.dot_dimension_numbers<[1], [0], [0], [1], [0, 0, 1, 1], [], []>} : vector<16x32xf32>, vector<32x128xf32>, vector<16x128xf32> -> vector<16x128xf32>
    %c0_125 = arith.constant 0 : index
    %c0_126 = arith.constant 0 : index
    %254 = vector.load %arg16[%c0_125, %c0_126] : memref<1x128xf32, #tpu.memory_space<vmem>>, vector<1x128xf32>
    %255 = vector.broadcast %254 : vector<1x128xf32> to vector<16x128xf32>
    %256 = arith.addf %253, %255 : vector<16x128xf32>
    %c0_127 = arith.constant 0 : index
    %c0_128 = arith.constant 0 : index
    %257 = vector.load %arg17[%c0_127, %c0_128] : memref<16x128xf32, #tpu.memory_space<vmem>>, vector<16x128xf32>
    tpu.vector_store %arg17[%c0_127, %c0_128], %256 {strides = array<i32>} : memref<16x128xf32, #tpu.memory_space<vmem>>, vector<16x128xf32>,
    return
  }
  func.func @transform_0(%arg0: i32) -> (i32, i32) {
    %c0_i32 = arith.constant 0 : i32
    %c0_i32_0 = arith.constant 0 : i32
    %c0_i32_1 = arith.constant 0 : i32
    return %c0_i32, %c0_i32_0 : i32, i32
  }
  func.func @transform_1(%arg0: i32) -> (i32, i32, i32) {
    %c0_i32 = arith.constant 0 : i32
    %c0_i32_0 = arith.constant 0 : i32
    %c0_i32_1 = arith.constant 0 : i32
    %c0_i32_2 = arith.constant 0 : i32
    return %c0_i32, %c0_i32_0, %c0_i32_1 : i32, i32, i32
  }
  func.func @transform_2(%arg0: i32) -> (i32, i32, i32) {
    %c0_i32 = arith.constant 0 : i32
    %c0_i32_0 = arith.constant 0 : i32
    %c0_i32_1 = arith.constant 0 : i32
    %c0_i32_2 = arith.constant 0 : i32
    return %c0_i32, %c0_i32_0, %c0_i32_1 : i32, i32, i32
  }
  func.func @transform_3(%arg0: i32) -> (i32, i32, i32, i32) {
    %c0_i32 = arith.constant 0 : i32
    %c0_i32_0 = arith.constant 0 : i32
    %c0_i32_1 = arith.constant 0 : i32
    %c0_i32_2 = arith.constant 0 : i32
    %c0_i32_3 = arith.constant 0 : i32
    return %c0_i32, %c0_i32_0, %c0_i32_1, %c0_i32_2 : i32, i32, i32, i32
  }
  func.func @transform_4(%arg0: i32) -> (i32, i32, i32, i32) {
    %c0_i32 = arith.constant 0 : i32
    %c0_i32_0 = arith.constant 0 : i32
    %c0_i32_1 = arith.constant 0 : i32
    %c0_i32_2 = arith.constant 0 : i32
    %c0_i32_3 = arith.constant 0 : i32
    return %c0_i32, %c0_i32_0, %c0_i32_1, %c0_i32_2 : i32, i32, i32, i32
  }
  func.func @transform_5(%arg0: i32) -> (i32, i32, i32) {
    %c0_i32 = arith.constant 0 : i32
    %c0_i32_0 = arith.constant 0 : i32
    %c0_i32_1 = arith.constant 0 : i32
    %c0_i32_2 = arith.constant 0 : i32
    return %c0_i32, %c0_i32_0, %c0_i32_1 : i32, i32, i32
  }
  func.func @transform_6(%arg0: i32) -> (i32, i32, i32) {
    %c0_i32 = arith.constant 0 : i32
    %c0_i32_0 = arith.constant 0 : i32
    %c0_i32_1 = arith.constant 0 : i32
    %c0_i32_2 = arith.constant 0 : i32
    return %c0_i32, %c0_i32_0, %c0_i32_1 : i32, i32, i32
  }
  func.func @transform_7(%arg0: i32) -> (i32, i32, i32) {
    %c0_i32 = arith.constant 0 : i32
    %c0_i32_0 = arith.constant 0 : i32
    %c0_i32_1 = arith.constant 0 : i32
    %c0_i32_2 = arith.constant 0 : i32
    return %c0_i32, %c0_i32_0, %c0_i32_1 : i32, i32, i32
  }
  func.func @transform_8(%arg0: i32) -> (i32, i32, i32) {
    %c0_i32 = arith.constant 0 : i32
    %c0_i32_0 = arith.constant 0 : i32
    %c0_i32_1 = arith.constant 0 : i32
    %c0_i32_2 = arith.constant 0 : i32
    return %c0_i32, %c0_i32_0, %c0_i32_1 : i32, i32, i32
  }
  func.func @transform_9(%arg0: i32) -> (i32, i32, i32) {
    %c0_i32 = arith.constant 0 : i32
    %c0_i32_0 = arith.constant 0 : i32
    %c0_i32_1 = arith.constant 0 : i32
    %c0_i32_2 = arith.constant 0 : i32
    return %c0_i32, %c0_i32_0, %c0_i32_1 : i32, i32, i32
  }
  func.func @transform_10(%arg0: i32) -> (i32, i32, i32) {
    %c0_i32 = arith.constant 0 : i32
    %c0_i32_0 = arith.constant 0 : i32
    %c0_i32_1 = arith.constant 0 : i32
    %c0_i32_2 = arith.constant 0 : i32
    return %c0_i32, %c0_i32_0, %c0_i32_1 : i32, i32, i32
  }
  func.func @transform_11(%arg0: i32) -> (i32, i32, i32) {
    %c0_i32 = arith.constant 0 : i32
    %c0_i32_0 = arith.constant 0 : i32
    %c0_i32_1 = arith.constant 0 : i32
    %c0_i32_2 = arith.constant 0 : i32
    return %c0_i32, %c0_i32_0, %c0_i32_1 : i32, i32, i32
  }
  func.func @transform_12(%arg0: i32) -> (i32, i32) {
    %c0_i32 = arith.constant 0 : i32
    %c0_i32_0 = arith.constant 0 : i32
    %c0_i32_1 = arith.constant 0 : i32
    return %c0_i32, %c0_i32_0 : i32, i32
  }
  func.func @transform_13(%arg0: i32) -> (i32, i32) {
    %c0_i32 = arith.constant 0 : i32
    %c0_i32_0 = arith.constant 0 : i32
    %c0_i32_1 = arith.constant 0 : i32
    return %c0_i32, %c0_i32_0 : i32, i32
  }
  func.func @transform_14(%arg0: i32) -> (i32, i32) {
    %c0_i32 = arith.constant 0 : i32
    %c0_i32_0 = arith.constant 0 : i32
    %c0_i32_1 = arith.constant 0 : i32
    return %c0_i32, %c0_i32_0 : i32, i32
  }
  func.func @transform_15(%arg0: i32) -> (i32, i32) {
    %c0_i32 = arith.constant 0 : i32
    %c0_i32_0 = arith.constant 0 : i32
    %c0_i32_1 = arith.constant 0 : i32
    return %c0_i32, %c0_i32_0 : i32, i32
  }
  func.func @transform_16(%arg0: i32) -> (i32, i32) {
    %c0_i32 = arith.constant 0 : i32
    %c0_i32_0 = arith.constant 0 : i32
    %c0_i32_1 = arith.constant 0 : i32
    return %c0_i32, %c0_i32_0 : i32, i32
  }
}

</mosaic_0001>

<bundles_post_ra>
// kernel: ece457b_gpt_forward.1
= control target key start
LH: loop header
LB: loop body
LE: loop exit
PB: predicated region body
PF: predicated region fallthrough
CT: control target
= control target key end

     0   :  { %vm62_vm0 = vcmask 261120   ;;  %v5703_v54 = vmov 0.0   ;;  %vm5704_vm1 = vmmov 0   ;;  %s5705_s17 = smov 120   ;;  %s5706_s18 = smov 112   ;;  %vm439_vm2 = vcmask 64512   ;;  %s6490_s0 = inlined_call_operand.vmem [shape: f32[16,32], index: 0, kind: input, shape index: {}]   ;;  %s6491_s3 = inlined_call_operand.vmem [shape: f32[2,4,32,24], index: 3, kind: input, shape index: {}]   ;;  %s6492_s1 = inlined_call_operand.vmem [shape: f32[2,1,32], index: 1, kind: input, shape index: {}]   ;;  %s6493_s2 = inlined_call_operand.vmem [shape: f32[2,1,32], index: 2, kind: input, shape index: {}]   ;;  %s6494_s4 = inlined_call_operand.vmem [shape: f32[2,4,8,32], index: 4, kind: input, shape index: {}]   ;;  %s6495_s5 = inlined_call_operand.vmem [shape: f32[2,1,32], index: 5, kind: input, shape index: {}]   ;;  %s6496_s8 = inlined_call_operand.vmem [shape: f32[2,32,128], index: 8, kind: input, shape index: {}]   ;;  %s6497_s10 = inlined_call_operand.vmem [shape: f32[2,128,32], index: 10, kind: input, shape index: {}]   ;;  %s6498_s6 = inlined_call_operand.vmem [shape: f32[2,1,32], index: 6, kind: input, shape index: {}]   ;;  %s6499_s7 = inlined_call_operand.vmem [shape: f32[2,1,32], index: 7, kind: input, shape index: {}]   ;;  %s6500_s9 = inlined_call_operand.vmem [shape: f32[2,1,128], index: 9, kind: input, shape index: {}]   ;;  %s6501_s11 = inlined_call_operand.vmem [shape: f32[2,1,32], index: 11, kind: input, shape index: {}]   ;;  %s6502_s14 = inlined_call_operand.vmem [shape: f32[32,128], index: 14, kind: input, shape index: {}]   ;;  %s6503_s12 = inlined_call_operand.vmem [shape: f32[1,32], index: 12, kind: input, shape index: {}]   ;;  %s6504_s13 = inlined_call_operand.vmem [shape: f32[1,32], index: 13, kind: input, shape index: {}]   ;;  %s6505_s15 = inlined_call_operand.vmem [shape: f32[1,128], index: 15, kind: input, shape index: {}]   ;;  %s6506_s16 = inlined_call_operand.vmem [shape: f32[16,128], index: 16, kind: output, shape index: {}]  }
   0x1   :  { %6508 = sst [smem:[#allocation2_spill]] %s6490_s0  ;;  %v106_v14 = vld [vmem:[%s6491_s3] sm:$0xff]  ;;  %v107_v15 = vld [vmem:[%s6491_s3 + $0x8] sm:$0xff]  ;;  %v108_v19 = vld [vmem:[%s6491_s3 + $0x10] sm:$0xff] }
   0x2   :  { %s6509_s23 = sld [smem:[#allocation2_spill]]  ;;  %v118_v16 = vld [vmem:[%s6491_s3 + $0x60] sm:$0xff]  ;;  %v5479_v17 = vpack.c.bf16 %v107_v15, %v106_v14  ;;  %v119_v18 = vld [vmem:[%s6491_s3 + $0x68] sm:$0xff]  ;;  %v109_v20 = vld [vmem:[%s6491_s3 + $0x18] sm:$0xff] }
   0x3   :  { %v5503_v21 = vpack.c.bf16 %v119_v18, %v118_v16  ;;  %v5483_v22 = vpack.c.bf16 %v109_v20, %v108_v19  ;;  %v120_v23 = vld [vmem:[%s6491_s3 + $0x70] sm:$0xff]  ;;  %v121_v24 = vld [vmem:[%s6491_s3 + $0x78] sm:$0xff]  ;;  %v110_v26 = vld [vmem:[%s6491_s3 + $0x20] sm:$0xff]  ;;  %v53_v19 = vlaneseq }
   0x4   :  { %5480 = vmatprep.subr.bf16.mxu0 %v5479_v17  ;;  %v5507_v25 = vpack.c.bf16 %v121_v24, %v120_v23  ;;  %v111_v27 = vld [vmem:[%s6491_s3 + $0x28] sm:$0xff]  ;;  %v4748_v36 = vld [vmem:[%s6492_s1] ss:$0 sm:$0xff]  ;;  %v112_v43 = vld [vmem:[%s6491_s3 + $0x30] sm:$0xff] }
   0x5   :  { %5482 = vmatpush3.bf16.msra.mxu0 %v5479_v17  ;;  %5504 = vmatprep.subr.bf16.mxu1 %v5503_v21  ;;  %v5487_v28 = vpack.c.bf16 %v111_v27, %v110_v26  ;;  %v4749_v38 = vld [vmem:[%s6493_s2] ss:$0 sm:$0xff]  ;;  %v113_v44 = vld [vmem:[%s6491_s3 + $0x38] sm:$0xff]  ;;  %v115_v49 = vld [vmem:[%s6491_s3 + $0x48] sm:$0xff]  ;;  %v54_v20 = vshrl.u32 %v53_v19, 7 }
   0x6   :  { %5506 = vmatpush3.bf16.msra.mxu1 %v5503_v21  ;;  %5484 = vmatprep.subr.bf16.mxu0 %v5483_v22  ;;  %v5491_v47 = vpack.c.bf16 %v113_v44, %v112_v43  ;;  %v114_v48 = vld [vmem:[%s6491_s3 + $0x40] sm:$0xff]  ;;  %v116_v51 = vld [vmem:[%s6491_s3 + $0x50] sm:$0xff]  ;;  %v117_v52 = vld [vmem:[%s6491_s3 + $0x58] sm:$0xff]  ;;  %v56_v21 = vand.u32 127, %v53_v19 }
   0x7   :  { %5508 = vmatprep.subr.bf16.mxu1 %v5507_v25  ;;  %v5495_v50 = vpack.c.bf16 %v115_v49, %v114_v48  ;;  %v5499_v53 = vpack.c.bf16 %v117_v52, %v116_v51 }
   0x8   :  { %v5795_v0 = vld [vmem:[%s6509_s23] sm:$0xff]  ;;  %v5800_v1 = vld [vmem:[%s6509_s23 + $0x8] sm:$0xff]  ;;  %vm5946_vm3 = vcmp.ge.s32.totalorder %v54_v20, %v56_v21 }
   0x9   :  { %v63_v2 = vsel %vm62_vm0, %v5795_v0, 0.0  ;;  %v66_v3 = vsel %vm62_vm0, %v5800_v1, 0.0  ;;  %5486 = vmatpush3.bf16.msra.mxu0 %v5483_v22 }
   0xa   :  { %64 = vadd.xlane.f32.xlu0 %v63_v2  ;;  %5510 = vmatpush3.bf16.msra.mxu1 %v5507_v25 }
   0xb   :  { %5488 = vmatprep.subr.bf16.mxu0 %v5487_v28  ;;  %5137 = vmatprep.subr.mxu1 %v5703_v54 }
   0xe   :  { %67 = vadd.xlane.f32.xlu0 %v66_v3 }
  0x97   :  { %v65_v4 = vpop.xlane.xlu0 %64 }
  0x98   :  { %v70_v5 = vmul.f32 0.03125, %v65_v4 }
  0x9a   :  { %v72_v6 = vsub.f32 %v5795_v0, %v70_v5 }
  0x9b   :  { %v68_v7 = vpop.xlane.xlu0 %67 }
  0x9c   :  { %v71_v8 = vmul.f32 0.03125, %v68_v7  ;;  %v74_v9 = vmul.f32 %v72_v6, %v72_v6 }
  0x9e   :  { %v73_v10 = vsub.f32 %v5800_v1, %v71_v8  ;;  %v76_v11 = vsel %vm62_vm0, %v74_v9, 0.0 }
  0x9f   :  { %77 = vadd.xlane.f32.xlu1 %v76_v11 }
  0xa0   :  { %v75_v12 = vmul.f32 %v73_v10, %v73_v10 }
  0xa2   :  { %v79_v13 = vsel %vm62_vm0, %v75_v12, 0.0 }
  0xa3   :  { %80 = vadd.xlane.f32.xlu1 %v79_v13 }
 0x12c   :  { %v78_v29 = vpop.xlane.xlu1 %77 }
 0x12d   :  { %v82_v30 = vmul.f32 0.03125, %v78_v29 }
 0x12f   :  { %v84_v31 = vadd.f32 1e-05, %v82_v30 }
 0x130   :  { %v81_v32 = vpop.xlane.xlu1 %80 }
 0x131   :  { %5635 = vrsqrt.f32 %v84_v31  ;;  %v83_v33 = vmul.f32 0.03125, %v81_v32 }
 0x133   :  { %v85_v34 = vadd.f32 1e-05, %v83_v33 }
 0x135   :  { %5637 = vrsqrt.f32 %v85_v34 }
 0x13b   :  { %v5636_v35 = vpop.eup %5635 }
 0x13c   :  { %v88_v37 = vmul.f32 %v5636_v35, %v72_v6 }
 0x13e   :  { %v96_v39 = vmul.f32 %v4748_v36, %v88_v37 }
 0x13f   :  { %v5638_v40 = vpop.eup %5637 }
 0x140   :  { %v104_v41 = vadd.f32 %v4749_v38, %v96_v39  ;;  %v89_v42 = vmul.f32 %v5638_v40, %v73_v10 }
 0x142   :  { %5096 = vmatprep.mubr.msk.f32.mxu0 %vm62_vm0, %v104_v41  ;;  %5129 = vmatprep.mubr.msk.f32.mxu1 %vm62_vm0, %v104_v41  ;;  %v97_v45 = vmul.f32 %v4748_v36, %v89_v42 }
 0x144   :  { %v105_v46 = vadd.f32 %v4749_v38, %v97_v45 }
 0x146   :  { %5097 = vmatmul.mubr.msk.f32.vlgmr.msra.gmra.mrb[0].mxu0 %vm62_vm0, %v105_v46  ;;  %5130 = vmatmul.mubr.msk.f32.vlgmr.msra.gmra.mrb[0].mxu1 %vm62_vm0, %v105_v46 }
 0x147   :  { %5490 = vmatpush3.bf16.msra.mxu0 %v5487_v28  ;;  %5107 = vmatprep.mubr.msk.f32.mxu0 %vm62_vm0, %v104_v41 }
 0x148   :  { %5492 = vmatprep.subr.bf16.mxu0 %v5491_v47  ;;  %5139 = vmatprep.mubr.msk.f32.mxu1 %vm5704_vm1, %v5703_v54 }
 0x14b   :  { %5494 = vmatpush3.bf16.msra.mxu0 %v5491_v47 }
 0x14c   :  { %5496 = vmatprep.subr.bf16.mxu0 %v5495_v50 }
 0x14e   :  { %5108 = vmatmul.mubr.msk.f32.vlgmr.msra.gmra.mrb[2].mxu0 %vm62_vm0, %v105_v46 }
 0x14f   :  { %5498 = vmatpush3.bf16.msra.mxu0 %v5495_v50  ;;  %5118 = vmatprep.mubr.msk.f32.mxu0 %vm62_vm0, %v104_v41 }
 0x150   :  { %5500 = vmatprep.subr.bf16.mxu0 %v5499_v53 }
 0x153   :  { %5502 = vmatpush3.bf16.msra.mxu0 %v5499_v53 }
 0x154   :  { %5132 = vmatprep.subr.mxu0 %v5703_v54 }
 0x156   :  { %5119 = vmatmul.mubr.msk.f32.vlgmr.msra.gmra.mrb[4].mxu0 %vm62_vm0, %v105_v46 }
 0x157   :  { %5134 = vmatprep.mubr.msk.f32.mxu0 %vm5704_vm1, %v5703_v54 }
 0x219   :  { %v5098_v55 = vpop.f32.mrb[0].mxu0  ;;  %v5878_v56 = vpop.f32.mrb[0].mxu1 }
 0x21a   :  { %v5880_v57 = vpop.f32.mrb[1].mxu1  ;;  %516 = vrot.lane.b32.xlu1 %v5098_v55, %s5705_s17  ;;  %v194_v58 = vpop.f32.mrb[1].mxu0  ;;  %v429_v3 = vmul.f32 0.70710677, %v5098_v55  ;;  %v435_v15 = vmul.f32 0.70710677, %v5878_v56 }
 0x21b   :  { %437 = vrot.lane.b32.xlu0 %v194_v58, %s5705_s17  ;;  %v428_v4 = vmul.f32 0.70710677, %v194_v58  ;;  %v434_v16 = vmul.f32 0.70710677, %v5880_v57 }
 0x221   :  { %v5109_v59 = vpop.f32.mrb[2].mxu0 }
 0x222   :  { %672 = vrot.lane.b32.xlu1 %v5109_v59, %s5705_s17  ;;  %v269_v60 = vpop.f32.mrb[3].mxu0  ;;  %v431_v6 = vmul.f32 0.70710677, %v5109_v59 }
 0x223   :  { %v430_v8 = vmul.f32 0.70710677, %v269_v60 }
 0x226   :  { %594 = vrot.lane.b32.xlu1 %v269_v60, %s5705_s17 }
 0x229   :  { %v5120_v61 = vpop.f32.mrb[4].mxu0 }
 0x22a   :  { %828 = vrot.lane.b32.xlu1 %v5120_v61, %s5705_s17  ;;  %v344_v62 = vpop.f32.mrb[5].mxu0  ;;  %v433_v11 = vmul.f32 0.70710677, %v5120_v61 }
 0x22b   :  { %750 = vrot.lane.b32.xlu0 %v344_v62, %s5705_s17  ;;  %v432_v12 = vmul.f32 0.70710677, %v344_v62 }
 0x22e   :  { %984 = vrot.lane.b32.xlu1 %v5878_v56, %s5705_s17 }
 0x22f   :  { %906 = vrot.lane.b32.xlu0 %v5880_v57, %s5705_s17 }
 0x232   :  { %1207 = vrot.lane.b32.xlu1 %v5098_v55, %s5706_s18 }
 0x233   :  { %1131 = vrot.lane.b32.xlu0 %v194_v58, %s5706_s18 }
 0x236   :  { %1359 = vrot.lane.b32.xlu1 %v5109_v59, %s5706_s18 }
 0x237   :  { %1283 = vrot.lane.b32.xlu0 %v269_v60, %s5706_s18 }
 0x23a   :  { %1511 = vrot.lane.b32.xlu1 %v5120_v61, %s5706_s18 }
 0x23b   :  { %1435 = vrot.lane.b32.xlu0 %v344_v62, %s5706_s18 }
 0x23e   :  { %1663 = vrot.lane.b32.xlu1 %v5878_v56, %s5706_s18 }
 0x23f   :  { %1587 = vrot.lane.b32.xlu0 %v5880_v57, %s5706_s18 }
 0x28c   :  { %v517_v63 = vpop.permute.xlu1 %516 }
 0x28d   :  { %5138 = vmatpush3.xpose.msk.msra.mxu1 %vm439_vm2, %v517_v63  ;;  %v438_v2 = vpop.permute.xlu0 %437 }
 0x28e   :  { %5133 = vmatpush3.xpose.msk.msra.mxu0 %vm439_vm2, %v438_v2  ;;  %5147 = vmatprep.subr.mxu1 %v5703_v54 }
 0x28f   :  { %5142 = vmatprep.subr.mxu0 %v5703_v54 }
 0x290   :  { %5140 = vmatmul.mubr.msk.f32.vlgmr.msra.gmra.mrb[2].mxu1 %vm439_vm2, %v429_v3 }
 0x291   :  { %5135 = vmatmul.mubr.msk.f32.vlgmr.msra.gmra.mrb[6].mxu0 %vm439_vm2, %v428_v4  ;;  %5149 = vmatprep.mubr.msk.f32.mxu1 %vm5704_vm1, %v5703_v54 }
 0x292   :  { %5144 = vmatprep.mubr.msk.f32.mxu0 %vm5704_vm1, %v5703_v54 }
 0x294   :  { %v673_v5 = vpop.permute.xlu1 %672 }
 0x295   :  { %5148 = vmatpush3.xpose.msk.msra.mxu1 %vm439_vm2, %v673_v5 }
 0x296   :  { %5157 = vmatprep.subr.mxu1 %v5703_v54 }
 0x298   :  { %5150 = vmatmul.mubr.msk.f32.vlgmr.msra.gmra.mrb[4].mxu1 %vm439_vm2, %v431_v6  ;;  %v595_v7 = vpop.permute.xlu1 %594 }
 0x299   :  { %5143 = vmatpush3.xpose.msk.msra.mxu0 %vm439_vm2, %v595_v7  ;;  %5159 = vmatprep.mubr.msk.f32.mxu1 %vm5704_vm1, %v5703_v54 }
 0x29a   :  { %5152 = vmatprep.subr.mxu0 %v5703_v54 }
 0x29c   :  { %5145 = vmatmul.mubr.msk.f32.vlgmr.msra.gmra.mrb[8].mxu0 %vm439_vm2, %v430_v8  ;;  %v829_v9 = vpop.permute.xlu1 %828 }
 0x29d   :  { %5158 = vmatpush3.xpose.msk.msra.mxu1 %vm439_vm2, %v829_v9  ;;  %v751_v10 = vpop.permute.xlu0 %750  ;;  %5154 = vmatprep.mubr.msk.f32.mxu0 %vm5704_vm1, %v5703_v54 }
 0x29e   :  { %5153 = vmatpush3.xpose.msk.msra.mxu0 %vm439_vm2, %v751_v10  ;;  %5167 = vmatprep.subr.mxu1 %v5703_v54 }
 0x29f   :  { %5162 = vmatprep.subr.mxu0 %v5703_v54 }
 0x2a0   :  { %v985_v13 = vpop.permute.xlu1 %984  ;;  %5160 = vmatmul.mubr.msk.f32.vlgmr.msra.gmra.mrb[6].mxu1 %vm439_vm2, %v433_v11 }
 0x2a1   :  { %5168 = vmatpush3.xpose.msk.msra.mxu1 %vm439_vm2, %v985_v13  ;;  %v907_v14 = vpop.permute.xlu0 %906  ;;  %5155 = vmatmul.mubr.msk.f32.vlgmr.msra.gmra.mrb[10].mxu0 %vm439_vm2, %v432_v12 }
 0x2a2   :  { %5163 = vmatpush3.xpose.msk.msra.mxu0 %vm439_vm2, %v907_v14  ;;  %5169 = vmatprep.mubr.msk.f32.mxu1 %vm5704_vm1, %v5703_v54 }
 0x2a3   :  { %5164 = vmatprep.mubr.msk.f32.mxu0 %vm5704_vm1, %v5703_v54  ;;  %5177 = vmatprep.subr.mxu1 %v5703_v54 }
 0x2a4   :  { %v1208_v17 = vpop.permute.xlu1 %1207  ;;  %5170 = vmatmul.mubr.msk.f32.vlgmr.msra.gmra.mrb[8].mxu1 %vm439_vm2, %v435_v15  ;;  %5172 = vmatprep.subr.mxu0 %v5703_v54 }
 0x2a5   :  { %5178 = vmatpush3.msra.mxu1 %v1208_v17  ;;  %v1132_v18 = vpop.permute.xlu0 %1131  ;;  %5165 = vmatmul.mubr.msk.f32.vlgmr.msra.gmra.mrb[12].mxu0 %vm439_vm2, %v434_v16 }
 0x2a6   :  { %5173 = vmatpush3.msra.mxu0 %v1132_v18  ;;  %5174 = vmatprep.mubr.msk.f32.mxu0 %vm5704_vm1, %v5703_v54 }
 0x2a7   :  { %5179 = vmatprep.mubr.msk.f32.mxu1 %vm5704_vm1, %v5703_v54  ;;  %5182 = vmatprep.subr.mxu0 %v5703_v54 }
 0x2a8   :  { %5187 = vmatprep.subr.mxu1 %v5703_v54 }
 0x363   :  { %v589_v23 = vpop.f32.mrb[2].mxu1 }
 0x364   :  { %v1064_v24 = vsel %vm5946_vm3, %v589_v23, -inf  ;;  %v511_v25 = vpop.f32.mrb[6].mxu0  ;;  %v5141_v26 = vpop.f32.mrb[3].mxu1 }
 0x365   :  { %v1072_v27 = vsel %vm439_vm2, %v1064_v24, -inf  ;;  %v1063_v28 = vsel %vm5946_vm3, %v511_v25, -inf  ;;  %v5136_v29 = vpop.f32.mrb[7].mxu0 }
 0x366   :  { %v1071_v30 = vsel %vm439_vm2, %v1063_v28, -inf }
 0x367   :  { %v1073_v31 = vmax.f32 %v1071_v30, %v1072_v27 }
 0x369   :  { %v1083_v32 = vsub.f32 %v1063_v28, %v1073_v31  ;;  %v1084_v33 = vsub.f32 %v1064_v24, %v1073_v31  ;;  %v1360_v31 = vpop.permute.xlu1 %1359 }
 0x36b   :  { %v1091_v34 = vmul.f32 1.442695, %v1083_v32  ;;  %v1093_v35 = vmul.f32 1.442695, %v1084_v33  ;;  %v745_v36 = vpop.f32.mrb[4].mxu1  ;;  %v1284_v32 = vpop.permute.xlu0 %1283 }
 0x36c   :  { %v5151_v37 = vpop.f32.mrb[5].mxu1  ;;  %v1066_v38 = vsel %vm5946_vm3, %v745_v36, -inf }
 0x36d   :  { %5639 = vpow2.f32 %v1091_v34  ;;  %v1075_v42 = vsel %vm439_vm2, %v1066_v38, -inf }
 0x36e   :  { %5641 = vpow2.f32 %v1093_v35 }
 0x36f   :  { %v667_v39 = vpop.f32.mrb[8].mxu0 }
 0x370   :  { %v1065_v40 = vsel %vm5946_vm3, %v667_v39, -inf  ;;  %v5146_v41 = vpop.f32.mrb[9].mxu0 }
 0x371   :  { %v1074_v43 = vsel %vm439_vm2, %v1065_v40, -inf }
 0x372   :  { %v1076_v44 = vmax.f32 %v1074_v43, %v1075_v42  ;;  %v1512_v43 = vpop.permute.xlu1 %1511 }
 0x373   :  { %v901_v45 = vpop.f32.mrb[6].mxu1 }
 0x374   :  { %v1085_v46 = vsub.f32 %v1065_v40, %v1076_v44  ;;  %v1086_v47 = vsub.f32 %v1066_v38, %v1076_v44  ;;  %v1068_v48 = vsel %vm5946_vm3, %v901_v45, -inf  ;;  %v823_v49 = vpop.f32.mrb[10].mxu0  ;;  %v5161_v50 = vpop.f32.mrb[7].mxu1 }
 0x375   :  { %v1078_v51 = vsel %vm439_vm2, %v1068_v48, -inf  ;;  %v1067_v52 = vsel %vm5946_vm3, %v823_v49, -inf  ;;  %v5156_v53 = vpop.f32.mrb[11].mxu0  ;;  %v1436_v44 = vpop.permute.xlu0 %1435 }
 0x376   :  { %v1095_v55 = vmul.f32 1.442695, %v1085_v46  ;;  %v1097_v56 = vmul.f32 1.442695, %v1086_v47  ;;  %v1077_v57 = vsel %vm439_vm2, %v1067_v52, -inf  ;;  %v1739_v53 = vld [vmem:[%s6494_s4] sm:$0xff] }
 0x377   :  { %v5640_v58 = vpop.eup %5639  ;;  %v1079_v59 = vmax.f32 %v1077_v57, %v1078_v51  ;;  %v1057_v60 = vpop.f32.mrb[8].mxu1  ;;  %v1742_v57 = vld [vmem:[%s6494_s4 + $0x18] sm:$0xff] }
 0x378   :  { %v5642_v61 = vpop.eup %5641  ;;  %v1107_v62 = vsel %vm439_vm2, %v5640_v58, 0.0  ;;  %5643 = vpow2.f32 %v1095_v55  ;;  %v1070_v63 = vsel %vm5946_vm3, %v1057_v60, -inf  ;;  %v979_v2 = vpop.f32.mrb[12].mxu0  ;;  %v1740_v55 = vld [vmem:[%s6494_s4 + $0x8] sm:$0xff] }
 0x379   :  { %v5171_v3 = vpop.f32.mrb[9].mxu1  ;;  %v1108_v4 = vsel %vm439_vm2, %v5642_v61, 0.0  ;;  %5645 = vpow2.f32 %v1097_v56  ;;  %v1087_v5 = vsub.f32 %v1067_v52, %v1079_v59  ;;  %v1088_v6 = vsub.f32 %v1068_v48, %v1079_v59  ;;  %v5166_v7 = vpop.f32.mrb[13].mxu0  ;;  %v1741_v56 = vld [vmem:[%s6494_s4 + $0x10] sm:$0xff] }
 0x37a   :  { %v1109_v8 = vadd.f32 %v1108_v4, %v1107_v62  ;;  %v1081_v9 = vsel %vm439_vm2, %v1070_v63, -inf  ;;  %v1069_v10 = vsel %vm5946_vm3, %v979_v2, -inf  ;;  %v1664_v48 = vpop.permute.xlu1 %1663  ;;  %v1588_v49 = vpop.permute.xlu0 %1587 }
 0x37b   :  { %v1099_v11 = vmul.f32 1.442695, %v1087_v5  ;;  %v1101_v12 = vmul.f32 1.442695, %v1088_v6  ;;  %v1080_v13 = vsel %vm439_vm2, %v1069_v10, -inf }
 0x37c   :  { %5647 = vrcp.f32 %v1109_v8  ;;  %v1082_v14 = vmax.f32 %v1080_v13, %v1081_v9 }
 0x37d   :  { %5649 = vpow2.f32 %v1099_v11 }
 0x37e   :  { %5651 = vpow2.f32 %v1101_v12  ;;  %v1089_v15 = vsub.f32 %v1069_v10, %v1082_v14  ;;  %v1090_v16 = vsub.f32 %v1070_v63, %v1082_v14 }
 0x380   :  { %v1103_v17 = vmul.f32 1.442695, %v1089_v15  ;;  %v1105_v18 = vmul.f32 1.442695, %v1090_v16 }
 0x382   :  { %v5644_v19 = vpop.eup %5643  ;;  %5653 = vpow2.f32 %v1103_v17 }
 0x383   :  { %v5646_v20 = vpop.eup %5645  ;;  %v1110_v21 = vsel %vm439_vm2, %v5644_v19, 0.0  ;;  %5655 = vpow2.f32 %v1105_v18 }
 0x384   :  { %v1111_v23 = vsel %vm439_vm2, %v5646_v20, 0.0 }
 0x385   :  { %v1112_v24 = vadd.f32 %v1111_v23, %v1110_v21 }
 0x386   :  { %v5648_v25 = vpop.eup %5647 }
 0x387   :  { %v5650_v26 = vpop.eup %5649  ;;  %5657 = vrcp.f32 %v1112_v24  ;;  %v1123_v27 = vmul.f32 %v5648_v25, %v5640_v58  ;;  %v1124_v28 = vmul.f32 %v5648_v25, %v5642_v61 }
 0x388   :  { %v5652_v29 = vpop.eup %5651  ;;  %v1113_v30 = vsel %vm439_vm2, %v5650_v26, 0.0 }
 0x389   :  { %v1114_v33 = vsel %vm439_vm2, %v5652_v29, 0.0  ;;  %5175 = vmatmul.mubr.msk.f32.vlgmr.msra.gmra.mrb[14].mxu0 %vm439_vm2, %v1123_v27  ;;  %5180 = vmatmul.mubr.msk.f32.vlgmr.msra.gmra.mrb[10].mxu1 %vm439_vm2, %v1124_v28 }
 0x38a   :  { %v1115_v34 = vadd.f32 %v1114_v33, %v1113_v30  ;;  %5183 = vmatpush3.msra.mxu0 %v1284_v32  ;;  %5188 = vmatpush3.msra.mxu1 %v1360_v31 }
 0x38b   :  { %5184 = vmatprep.mubr.msk.f32.mxu0 %vm5704_vm1, %v5703_v54  ;;  %5189 = vmatprep.mubr.msk.f32.mxu1 %vm5704_vm1, %v5703_v54 }
 0x38c   :  { %v5654_v35 = vpop.eup %5653  ;;  %5659 = vrcp.f32 %v1115_v34  ;;  %5192 = vmatprep.subr.mxu0 %v5703_v54  ;;  %5197 = vmatprep.subr.mxu1 %v5703_v54 }
 0x38d   :  { %v5656_v36 = vpop.eup %5655  ;;  %v1116_v37 = vsel %vm439_vm2, %v5654_v35, 0.0 }
 0x38e   :  { %v1117_v38 = vsel %vm439_vm2, %v5656_v36, 0.0 }
 0x38f   :  { %v1118_v39 = vadd.f32 %v1117_v38, %v1116_v37 }
 0x391   :  { %v5658_v40 = vpop.eup %5657  ;;  %5661 = vrcp.f32 %v1118_v39 }
 0x392   :  { %v1125_v41 = vmul.f32 %v5658_v40, %v5644_v19  ;;  %v1126_v42 = vmul.f32 %v5658_v40, %v5646_v20 }
 0x394   :  { %5185 = vmatmul.mubr.msk.f32.vlgmr.msra.gmra.mrb[16].mxu0 %vm439_vm2, %v1125_v41  ;;  %5190 = vmatmul.mubr.msk.f32.vlgmr.msra.gmra.mrb[12].mxu1 %vm439_vm2, %v1126_v42 }
 0x395   :  { %5193 = vmatpush3.msra.mxu0 %v1436_v44  ;;  %5198 = vmatpush3.msra.mxu1 %v1512_v43 }
 0x396   :  { %v5660_v45 = vpop.eup %5659  ;;  %5194 = vmatprep.mubr.msk.f32.mxu0 %vm5704_vm1, %v5703_v54  ;;  %5199 = vmatprep.mubr.msk.f32.mxu1 %vm5704_vm1, %v5703_v54 }
 0x397   :  { %5202 = vmatprep.subr.mxu0 %v5703_v54  ;;  %5207 = vmatprep.subr.mxu1 %v5703_v54  ;;  %v1127_v46 = vmul.f32 %v5660_v45, %v5650_v26  ;;  %v1128_v47 = vmul.f32 %v5660_v45, %v5652_v29 }
 0x399   :  { %5195 = vmatmul.mubr.msk.f32.vlgmr.msra.gmra.mrb[18].mxu0 %vm439_vm2, %v1127_v46  ;;  %5200 = vmatmul.mubr.msk.f32.vlgmr.msra.gmra.mrb[14].mxu1 %vm439_vm2, %v1128_v47 }
 0x39a   :  { %5203 = vmatpush3.msra.mxu0 %v1588_v49  ;;  %5208 = vmatpush3.msra.mxu1 %v1664_v48 }
 0x39b   :  { %v5662_v50 = vpop.eup %5661  ;;  %5204 = vmatprep.mubr.msk.f32.mxu0 %vm5704_vm1, %v5703_v54  ;;  %5209 = vmatprep.mubr.msk.f32.mxu1 %vm5704_vm1, %v5703_v54 }
 0x39c   :  { %v1129_v51 = vmul.f32 %v5662_v50, %v5654_v35  ;;  %v1130_v52 = vmul.f32 %v5662_v50, %v5656_v36  ;;  %5212 = vmatprep.subr.mxu0 %v1739_v53  ;;  %5217 = vmatprep.subr.mxu1 %v1740_v55  ;;  %v4790_v35 = vld [vmem:[%s6495_s5] ss:$0 sm:$0xff] }
 0x39d   :  { %v2136_v50 = vld [vmem:[%s6496_s8] sm:$0xff] }
 0x39e   :  { %5205 = vmatmul.mubr.msk.f32.vlgmr.msra.gmra.mrb[20].mxu0 %vm439_vm2, %v1129_v51  ;;  %5210 = vmatmul.mubr.msk.f32.vlgmr.msra.gmra.mrb[16].mxu1 %vm439_vm2, %v1130_v52  ;;  %v2137_v51 = vld [vmem:[%s6496_s8 + $0x8] sm:$0xff] }
 0x39f   :  { %5213 = vmatpush3.msra.mxu0 %v1739_v53  ;;  %5218 = vmatpush3.msra.mxu1 %v1740_v55  ;;  %v5511_v52 = vpack.c.bf16 %v2137_v51, %v2136_v50  ;;  %v2138_v53 = vld [vmem:[%s6496_s8 + $0x10] sm:$0xff]  ;;  %v2139_v55 = vld [vmem:[%s6496_s8 + $0x18] sm:$0xff] }
 0x3a0   :  { %5222 = vmatprep.subr.mxu0 %v1741_v56  ;;  %5227 = vmatprep.subr.mxu1 %v1742_v57 }
 0x45c   :  { %v1203_v58 = vpop.f32.mrb[14].mxu0  ;;  %v1279_v59 = vpop.f32.mrb[10].mxu1 }
 0x45d   :  { %v5176_v60 = vpop.f32.mrb[15].mxu0  ;;  %v5181_v61 = vpop.f32.mrb[11].mxu1  ;;  %5214 = vmatprep.mubr.msk.f32.mxu0 %vm439_vm2, %v1203_v58  ;;  %v2231_v58 = vld [vmem:[%s6497_s10 + $0x8] sm:$0xff] }
 0x45e   :  { %5215 = vmatmul.mubr.msk.f32.vlgmr.msra.gmra.mrb[22].mxu0 %vm439_vm2, %v1279_v59  ;;  %v2232_v59 = vld [vmem:[%s6497_s10 + $0x10] sm:$0xff]  ;;  %v2233_v61 = vld [vmem:[%s6497_s10 + $0x18] sm:$0xff] }
 0x45f   :  { %5223 = vmatpush3.msra.mxu0 %v1741_v56  ;;  %v5515_v56 = vpack.c.bf16 %v2139_v55, %v2138_v53 }
 0x460   :  { %5512 = vmatprep.subr.bf16.mxu0 %v5511_v52 }
 0x467   :  { %v1355_v62 = vpop.f32.mrb[16].mxu0  ;;  %v1431_v63 = vpop.f32.mrb[12].mxu1 }
 0x468   :  { %v5186_v2 = vpop.f32.mrb[17].mxu0  ;;  %v5191_v3 = vpop.f32.mrb[13].mxu1  ;;  %5219 = vmatprep.mubr.msk.f32.mxu1 %vm439_vm2, %v1355_v62  ;;  %v5523_v62 = vpack.c.bf16 %v2233_v61, %v2232_v59  ;;  %v4801_v61 = vld [vmem:[%s6491_s3 + $0x80] sm:$0xff] }
 0x469   :  { %5220 = vmatmul.mubr.msk.f32.vlgmr.msra.gmra.mrb[18].mxu1 %vm439_vm2, %v1431_v63  ;;  %v2234_v63 = vld [vmem:[%s6497_s10 + $0x20] sm:$0xff]  ;;  %v2235_v2 = vld [vmem:[%s6497_s10 + $0x28] sm:$0xff] }
 0x46a   :  { %5228 = vmatpush3.msra.mxu1 %v1742_v57  ;;  %v2230_v57 = vld [vmem:[%s6497_s10] sm:$0xff]  ;;  %v5527_v3 = vpack.c.bf16 %v2235_v2, %v2234_v63  ;;  %v4803_v2 = vld [vmem:[%s6491_s3 + $0x90] sm:$0xff] }
 0x46b   :  { %v5519_v60 = vpack.c.bf16 %v2231_v58, %v2230_v57 }
 0x46c   :  { %v1507_v4 = vpop.f32.mrb[18].mxu0  ;;  %v1583_v5 = vpop.f32.mrb[14].mxu1 }
 0x46d   :  { %v5196_v6 = vpop.f32.mrb[19].mxu0  ;;  %v5201_v7 = vpop.f32.mrb[15].mxu1  ;;  %5224 = vmatprep.mubr.msk.f32.mxu0 %vm439_vm2, %v1507_v4  ;;  %5520 = vmatprep.subr.bf16.mxu1 %v5519_v60  ;;  %v2236_v4 = vld [vmem:[%s6497_s10 + $0x30] sm:$0xff] }
 0x46e   :  { %5225 = vmatmul.mubr.msk.f32.vlgmr.msra.gmra.mrb[24].mxu0 %vm439_vm2, %v1583_v5  ;;  %v2237_v5 = vld [vmem:[%s6497_s10 + $0x38] sm:$0xff]  ;;  %v2238_v7 = vld [vmem:[%s6497_s10 + $0x40] sm:$0xff] }
 0x46f   :  { %5514 = vmatpush3.bf16.msra.mxu0 %v5511_v52  ;;  %v5531_v6 = vpack.c.bf16 %v2237_v5, %v2236_v4  ;;  %v4805_v5 = vld [vmem:[%s6491_s3 + $0xa0] sm:$0xff] }
 0x470   :  { %5516 = vmatprep.subr.bf16.mxu0 %v5515_v56 }
 0x471   :  { %v1659_v8 = vpop.f32.mrb[20].mxu0  ;;  %v1735_v9 = vpop.f32.mrb[16].mxu1 }
 0x472   :  { %v5206_v10 = vpop.f32.mrb[21].mxu0  ;;  %v5211_v11 = vpop.f32.mrb[17].mxu1  ;;  %5229 = vmatprep.mubr.msk.f32.mxu1 %vm439_vm2, %v1659_v8  ;;  %v2239_v8 = vld [vmem:[%s6497_s10 + $0x48] sm:$0xff] }
 0x473   :  { %5230 = vmatmul.mubr.msk.f32.vlgmr.msra.gmra.mrb[20].mxu1 %vm439_vm2, %v1735_v9  ;;  %5518 = vmatpush3.bf16.msra.mxu0 %v5515_v56  ;;  %v5535_v9 = vpack.c.bf16 %v2239_v8, %v2238_v7  ;;  %v2240_v10 = vld [vmem:[%s6497_s10 + $0x50] sm:$0xff]  ;;  %v2241_v11 = vld [vmem:[%s6497_s10 + $0x58] sm:$0xff] }
 0x474   :  { %5522 = vmatpush3.bf16.msra.mxu1 %v5519_v60 }
 0x475   :  { %5524 = vmatprep.subr.bf16.mxu1 %v5523_v62 }
 0x478   :  { %5526 = vmatpush3.bf16.msra.mxu1 %v5523_v62  ;;  %v4802_v62 = vld [vmem:[%s6491_s3 + $0x88] sm:$0xff] }
 0x479   :  { %5528 = vmatprep.subr.bf16.mxu1 %v5527_v3  ;;  %v5551_v63 = vpack.c.bf16 %v4802_v62, %v4801_v61 }
 0x47b   :  { %5552 = vmatprep.subr.bf16.mxu0 %v5551_v63 }
 0x47c   :  { %5530 = vmatpush3.bf16.msra.mxu1 %v5527_v3  ;;  %v4804_v3 = vld [vmem:[%s6491_s3 + $0x98] sm:$0xff] }
 0x47d   :  { %5532 = vmatprep.subr.bf16.mxu1 %v5531_v6  ;;  %v5555_v4 = vpack.c.bf16 %v4804_v3, %v4803_v2 }
 0x480   :  { %5534 = vmatpush3.bf16.msra.mxu1 %v5531_v6  ;;  %v4806_v6 = vld [vmem:[%s6491_s3 + $0xa8] sm:$0xff] }
 0x481   :  { %5536 = vmatprep.subr.bf16.mxu1 %v5535_v9  ;;  %v5559_v7 = vpack.c.bf16 %v4806_v6, %v4805_v5 }
 0x484   :  { %5538 = vmatpush3.bf16.msra.mxu1 %v5535_v9 }
 0x531   :  { %v5216_v12 = vpop.f32.mrb[22].mxu0 }
 0x532   :  { %v1815_v13 = vpop.f32.mrb[23].mxu0  ;;  %v2074_v15 = vsel %vm62_vm0, %v5216_v12, 0.0  ;;  %v5539_v12 = vpack.c.bf16 %v2241_v11, %v2240_v10 }
 0x533   :  { %v2067_v18 = vsel %vm62_vm0, %v1815_v13, 0.0  ;;  %v2242_v13 = vld [vmem:[%s6497_s10 + $0x60] sm:$0xff] }
 0x534   :  { %5540 = vmatprep.subr.bf16.mxu1 %v5539_v12 }
 0x535   :  { %5542 = vmatpush3.bf16.msra.mxu1 %v5539_v12 }
 0x53c   :  { %v5221_v14 = vpop.f32.mrb[18].mxu1 }
 0x53d   :  { %v2075_v16 = vsel %vm62_vm0, %v5221_v14, 0.0  ;;  %v1896_v17 = vpop.f32.mrb[19].mxu1  ;;  %v2243_v14 = vld [vmem:[%s6497_s10 + $0x68] sm:$0xff] }
 0x53e   :  { %v2076_v19 = vadd.f32 %v2075_v16, %v2074_v15  ;;  %v2068_v20 = vsel %vm62_vm0, %v1896_v17, 0.0  ;;  %v5543_v15 = vpack.c.bf16 %v2243_v14, %v2242_v13 }
 0x53f   :  { %v2069_v21 = vadd.f32 %v2068_v20, %v2067_v18 }
 0x540   :  { %5544 = vmatprep.subr.bf16.mxu1 %v5543_v15 }
 0x541   :  { %v5226_v23 = vpop.f32.mrb[24].mxu0  ;;  %5546 = vmatpush3.bf16.msra.mxu1 %v5543_v15  ;;  %v4799_v15 = vld [vmem:[%s6492_s1 + $0x1] ss:$0 sm:$0xff] }
 0x542   :  { %v2077_v24 = vsel %vm62_vm0, %v5226_v23, 0.0  ;;  %v1977_v25 = vpop.f32.mrb[25].mxu0 }
 0x543   :  { %v2078_v26 = vadd.f32 %v2077_v24, %v2076_v19  ;;  %v2070_v27 = vsel %vm62_vm0, %v1977_v25, 0.0  ;;  %v4791_v24 = vld [vmem:[%s6498_s6] ss:$0 sm:$0xff] }
 0x544   :  { %v2071_v28 = vadd.f32 %v2070_v27, %v2069_v21 }
 0x546   :  { %v5231_v29 = vpop.f32.mrb[20].mxu1 }
 0x547   :  { %v2079_v30 = vsel %vm62_vm0, %v5231_v29, 0.0  ;;  %v2058_v31 = vpop.f32.mrb[21].mxu1 }
 0x548   :  { %v2080_v32 = vadd.f32 %v2079_v30, %v2078_v26  ;;  %v2072_v33 = vsel %vm62_vm0, %v2058_v31, 0.0  ;;  %v4792_v26 = vld [vmem:[%s6499_s7] ss:$0 sm:$0xff] }
 0x549   :  { %v2073_v34 = vadd.f32 %v2072_v33, %v2071_v28  ;;  %v2244_v33 = vld [vmem:[%s6497_s10 + $0x70] sm:$0xff] }
 0x54a   :  { %v2082_v36 = vadd.f32 %v2080_v32, %v5800_v1 }
 0x54b   :  { %v2081_v37 = vadd.f32 %v2073_v34, %v5795_v0  ;;  %v2245_v34 = vld [vmem:[%s6497_s10 + $0x78] sm:$0xff] }
 0x54c   :  { %v6039_v38 = vadd.f32 %v4790_v35, %v2082_v36  ;;  %v4793_v36 = vld [vmem:[%s6500_s9] ss:$0 sm:$0xff] }
 0x54d   :  { %v6041_v39 = vadd.f32 %v4790_v35, %v2081_v37  ;;  %v5547_v35 = vpack.c.bf16 %v2245_v34, %v2244_v33  ;;  %v4813_v34 = vld [vmem:[%s6491_s3 + $0xe0] sm:$0xff] }
 0x54e   :  { %v2097_v40 = vsel %vm62_vm0, %v6039_v38, 0.0 }
 0x54f   :  { %2098 = vadd.xlane.f32.xlu1 %v2097_v40  ;;  %v2094_v41 = vsel %vm62_vm0, %v6041_v39, 0.0  ;;  %5548 = vmatprep.subr.bf16.mxu1 %v5547_v35 }
 0x550   :  { %2095 = vadd.xlane.f32.xlu0 %v2094_v41  ;;  %5550 = vmatpush3.bf16.msra.mxu1 %v5547_v35  ;;  %v4814_v35 = vld [vmem:[%s6491_s3 + $0xe8] sm:$0xff] }
 0x551   :  { %5322 = vmatprep.subr.mxu1 %v5703_v54 }
 0x5dc   :  { %v2099_v42 = vpop.xlane.xlu1 %2098 }
 0x5dd   :  { %v2101_v43 = vmul.f32 0.03125, %v2099_v42  ;;  %v2096_v44 = vpop.xlane.xlu0 %2095 }
 0x5de   :  { %v2100_v45 = vmul.f32 0.03125, %v2096_v44 }
 0x5df   :  { %v6048_v1 = vsub.f32 %v6039_v38, %v2101_v43 }
 0x5e0   :  { %v6051_v0 = vsub.f32 %v6041_v39, %v2100_v45  ;;  %v4796_v45 = vld [vmem:[%s6501_s11] ss:$0 sm:$0xff] }
 0x5e1   :  { %v2105_v48 = vmul.f32 %v6048_v1, %v6048_v1 }
 0x5e2   :  { %v2104_v46 = vmul.f32 %v6051_v0, %v6051_v0 }
 0x5e3   :  { %v2109_v49 = vsel %vm62_vm0, %v2105_v48, 0.0 }
 0x5e4   :  { %v2106_v47 = vsel %vm62_vm0, %v2104_v46, 0.0 }
 0x5e5   :  { %2107 = vadd.xlane.f32.xlu0 %v2106_v47 }
 0x5e9   :  { %2110 = vadd.xlane.f32.xlu0 %v2109_v49 }
 0x672   :  { %v2108_v16 = vpop.xlane.xlu0 %2107 }
 0x673   :  { %v2112_v17 = vmul.f32 0.03125, %v2108_v16 }
 0x675   :  { %v2114_v18 = vadd.f32 1e-05, %v2112_v17 }
 0x676   :  { %v2111_v19 = vpop.xlane.xlu0 %2110 }
 0x677   :  { %5663 = vrsqrt.f32 %v2114_v18  ;;  %v2113_v20 = vmul.f32 0.03125, %v2111_v19  ;;  %v4800_v19 = vld [vmem:[%s6493_s2 + $0x1] ss:$0 sm:$0xff] }
 0x679   :  { %v2115_v21 = vadd.f32 1e-05, %v2113_v20 }
 0x67b   :  { %5665 = vrsqrt.f32 %v2115_v21 }
 0x681   :  { %v5664_v23 = vpop.eup %5663 }
 0x682   :  { %v2118_v25 = vmul.f32 %v5664_v23, %v6051_v0  ;;  %v4807_v23 = vld [vmem:[%s6491_s3 + $0xb0] sm:$0xff] }
 0x684   :  { %v2126_v27 = vmul.f32 %v4791_v24, %v2118_v25 }
 0x685   :  { %v5666_v28 = vpop.eup %5665 }
 0x686   :  { %v2119_v29 = vmul.f32 %v5666_v28, %v6048_v1  ;;  %v2134_v30 = vadd.f32 %v4792_v26, %v2126_v27  ;;  %v4809_v28 = vld [vmem:[%s6491_s3 + $0xc0] sm:$0xff] }
 0x688   :  { %v2127_v31 = vmul.f32 %v4791_v24, %v2119_v29  ;;  %5240 = vmatprep.mubr.msk.f32.mxu0 %vm62_vm0, %v2134_v30  ;;  %v4808_v24 = vld [vmem:[%s6491_s3 + $0xb8] sm:$0xff]  ;;  %v4810_v29 = vld [vmem:[%s6491_s3 + $0xc8] sm:$0xff] }
 0x689   :  { %v5563_v27 = vpack.c.bf16 %v4808_v24, %v4807_v23  ;;  %v5567_v30 = vpack.c.bf16 %v4810_v29, %v4809_v28 }
 0x68a   :  { %v2135_v32 = vadd.f32 %v4792_v26, %v2127_v31  ;;  %v4811_v31 = vld [vmem:[%s6491_s3 + $0xd0] sm:$0xff] }
 0x68c   :  { %5241 = vmatmul.mubr.msk.f32.vlgmr.msra.gmra.mrb[26].mxu0 %vm62_vm0, %v2135_v32  ;;  %v4812_v32 = vld [vmem:[%s6491_s3 + $0xd8] sm:$0xff] }
 0x68d   :  { %5554 = vmatpush3.bf16.msra.mxu0 %v5551_v63  ;;  %v5571_v33 = vpack.c.bf16 %v4812_v32, %v4811_v31 }
 0x68e   :  { %5556 = vmatprep.subr.bf16.mxu0 %v5555_v4 }
 0x691   :  { %5558 = vmatpush3.bf16.msra.mxu0 %v5555_v4 }
 0x692   :  { %5560 = vmatprep.subr.bf16.mxu0 %v5559_v7 }
 0x75f   :  { %v5242_v37 = vpop.f32.mrb[26].mxu0 }
 0x760   :  { %v2225_v40 = vadd.f32 %v5242_v37, %v4793_v36  ;;  %v2219_v41 = vpop.f32.mrb[27].mxu0  ;;  %v4815_v37 = vld [vmem:[%s6491_s3 + $0xf0] sm:$0xff] }
 0x761   :  { %v2220_v42 = vadd.f32 %v4793_v36, %v2219_v41  ;;  %v5575_v36 = vpack.c.bf16 %v4814_v35, %v4813_v34 }
 0x762   :  { %v2229_v44 = vmax.f32 %v2225_v40, 0.0  ;;  %v4816_v40 = vld [vmem:[%s6491_s3 + $0xf8] sm:$0xff] }
 0x763   :  { %v2228_v43 = vmax.f32 %v2220_v42, 0.0  ;;  %v5579_v41 = vpack.c.bf16 %v4816_v40, %v4815_v37 }
 0x765   :  { %5275 = vmatprep.mubr.f32.mxu1 %v2228_v43 }
 0x766   :  { %5276 = vmatmul.mubr.f32.vlgmr.msra.gmra.mrb[22].mxu1 %v2229_v44 }
 0x767   :  { %5324 = vmatprep.mubr.msk.f32.mxu1 %vm5704_vm1, %v5703_v54 }
 0x839   :  { %v5277_v1 = vpop.f32.mrb[22].mxu1 }
 0x83a   :  { %v2325_v0 = vadd.f32 %v5277_v1, %v4796_v45  ;;  %v2319_v46 = vpop.f32.mrb[23].mxu1 }
 0x83b   :  { %v2320_v47 = vadd.f32 %v4796_v45, %v2319_v46 }
 0x83c   :  { %v6139_v48 = vadd.f32 %v2325_v0, %v6039_v38 }
 0x83d   :  { %v6142_v49 = vadd.f32 %v2320_v47, %v6041_v39 }
 0x83e   :  { %v2337_v50 = vsel %vm62_vm0, %v6139_v48, 0.0 }
 0x83f   :  { %2338 = vadd.xlane.f32.xlu1 %v2337_v50  ;;  %v2334_v51 = vsel %vm62_vm0, %v6142_v49, 0.0 }
 0x840   :  { %2335 = vadd.xlane.f32.xlu0 %v2334_v51 }
 0x8cc   :  { %v2339_v52 = vpop.xlane.xlu1 %2338 }
 0x8cd   :  { %v2341_v53 = vmul.f32 0.03125, %v2339_v52  ;;  %v2336_v55 = vpop.xlane.xlu0 %2335 }
 0x8ce   :  { %v2340_v56 = vmul.f32 0.03125, %v2336_v55 }
 0x8cf   :  { %v2343_v57 = vsub.f32 %v6139_v48, %v2341_v53 }
 0x8d0   :  { %v2342_v38 = vsub.f32 %v6142_v49, %v2340_v56 }
 0x8d1   :  { %v2345_v58 = vmul.f32 %v2343_v57, %v2343_v57 }
 0x8d2   :  { %v2344_v59 = vmul.f32 %v2342_v38, %v2342_v38 }
 0x8d3   :  { %v2349_v39 = vsel %vm62_vm0, %v2345_v58, 0.0 }
 0x8d4   :  { %2350 = vadd.xlane.f32.xlu1 %v2349_v39  ;;  %v2346_v60 = vsel %vm62_vm0, %v2344_v59, 0.0 }
 0x8d5   :  { %2347 = vadd.xlane.f32.xlu0 %v2346_v60 }
 0x961   :  { %v2351_v8 = vpop.xlane.xlu1 %2350 }
 0x962   :  { %v2353_v9 = vmul.f32 0.03125, %v2351_v8  ;;  %v2348_v10 = vpop.xlane.xlu0 %2347 }
 0x963   :  { %v2352_v11 = vmul.f32 0.03125, %v2348_v10 }
 0x964   :  { %v2355_v12 = vadd.f32 1e-05, %v2353_v9 }
 0x965   :  { %v2354_v13 = vadd.f32 1e-05, %v2352_v11 }
 0x966   :  { %5667 = vrsqrt.f32 %v2355_v12 }
 0x967   :  { %5669 = vrsqrt.f32 %v2354_v13 }
 0x970   :  { %v5668_v14 = vpop.eup %5667 }
 0x971   :  { %v5670_v16 = vpop.eup %5669  ;;  %v2359_v17 = vmul.f32 %v5668_v14, %v2343_v57 }
 0x972   :  { %v2358_v18 = vmul.f32 %v5670_v16, %v2342_v38 }
 0x973   :  { %v2367_v20 = vmul.f32 %v4799_v15, %v2359_v17 }
 0x974   :  { %v2366_v21 = vmul.f32 %v4799_v15, %v2358_v18 }
 0x975   :  { %v2375_v26 = vadd.f32 %v4800_v19, %v2367_v20 }
 0x976   :  { %v2374_v25 = vadd.f32 %v4800_v19, %v2366_v21 }
 0x978   :  { %5286 = vmatprep.mubr.msk.f32.mxu0 %vm62_vm0, %v2374_v25 }
 0x979   :  { %5287 = vmatmul.mubr.msk.f32.vlgmr.msra.gmra.mrb[28].mxu0 %vm62_vm0, %v2375_v26 }
 0x97a   :  { %5562 = vmatpush3.bf16.msra.mxu0 %v5559_v7  ;;  %5297 = vmatprep.mubr.msk.f32.mxu0 %vm62_vm0, %v2374_v25 }
 0x97b   :  { %5564 = vmatprep.subr.bf16.mxu0 %v5563_v27 }
 0x97e   :  { %5566 = vmatpush3.bf16.msra.mxu0 %v5563_v27 }
 0x97f   :  { %5568 = vmatprep.subr.bf16.mxu0 %v5567_v30 }
 0x981   :  { %5298 = vmatmul.mubr.msk.f32.vlgmr.msra.gmra.mrb[30].mxu0 %vm62_vm0, %v2375_v26 }
 0x982   :  { %5570 = vmatpush3.bf16.msra.mxu0 %v5567_v30  ;;  %5308 = vmatprep.mubr.msk.f32.mxu0 %vm62_vm0, %v2374_v25 }
 0x983   :  { %5572 = vmatprep.subr.bf16.mxu0 %v5571_v33 }
 0x986   :  { %5574 = vmatpush3.bf16.msra.mxu0 %v5571_v33 }
 0x987   :  { %5576 = vmatprep.subr.bf16.mxu0 %v5575_v36 }
 0x989   :  { %5309 = vmatmul.mubr.msk.f32.vlgmr.msra.gmra.mrb[32].mxu0 %vm62_vm0, %v2375_v26 }
 0x98a   :  { %5578 = vmatpush3.bf16.msra.mxu0 %v5575_v36  ;;  %5319 = vmatprep.mubr.msk.f32.mxu0 %vm62_vm0, %v2374_v25 }
 0x98b   :  { %5580 = vmatprep.subr.bf16.mxu0 %v5579_v41 }
 0x98e   :  { %5582 = vmatpush3.bf16.msra.mxu0 %v5579_v41 }
 0x98f   :  { %5332 = vmatprep.subr.mxu0 %v5703_v54 }
 0x991   :  { %5320 = vmatmul.mubr.msk.f32.vlgmr.msra.gmra.mrb[34].mxu0 %vm62_vm0, %v2375_v26 }
 0x992   :  { %5334 = vmatprep.mubr.msk.f32.mxu0 %vm5704_vm1, %v5703_v54 }
 0xa4c   :  { %v5288_v42 = vpop.f32.mrb[28].mxu0 }
 0xa4d   :  { %2786 = vrot.lane.b32.xlu1 %v5288_v42, %s5705_s17  ;;  %v2465_v43 = vpop.f32.mrb[29].mxu0  ;;  %v2700_v53 = vmul.f32 0.70710677, %v5288_v42 }
 0xa4e   :  { %2708 = vrot.lane.b32.xlu0 %v2465_v43, %s5705_s17  ;;  %v2699_v51 = vmul.f32 0.70710677, %v2465_v43 }
 0xa54   :  { %v5299_v44 = vpop.f32.mrb[30].mxu0 }
 0xa55   :  { %2942 = vrot.lane.b32.xlu1 %v5299_v44, %s5705_s17  ;;  %v2540_v45 = vpop.f32.mrb[31].mxu0  ;;  %v2702_v56 = vmul.f32 0.70710677, %v5299_v44 }
 0xa56   :  { %v2701_v38 = vmul.f32 0.70710677, %v2540_v45 }
 0xa59   :  { %2864 = vrot.lane.b32.xlu1 %v2540_v45, %s5705_s17 }
 0xa5c   :  { %v5310_v1 = vpop.f32.mrb[32].mxu0 }
 0xa5d   :  { %3098 = vrot.lane.b32.xlu1 %v5310_v1, %s5705_s17  ;;  %v2615_v0 = vpop.f32.mrb[33].mxu0  ;;  %v2704_v39 = vmul.f32 0.70710677, %v5310_v1 }
 0xa5e   :  { %3020 = vrot.lane.b32.xlu0 %v2615_v0, %s5705_s17  ;;  %v2703_v60 = vmul.f32 0.70710677, %v2615_v0 }
 0xa64   :  { %v5321_v46 = vpop.f32.mrb[34].mxu0 }
 0xa65   :  { %3254 = vrot.lane.b32.xlu1 %v5321_v46, %s5705_s17  ;;  %v2690_v47 = vpop.f32.mrb[35].mxu0  ;;  %v2706_v63 = vmul.f32 0.70710677, %v5321_v46 }
 0xa66   :  { %3176 = vrot.lane.b32.xlu0 %v2690_v47, %s5705_s17  ;;  %v2705_v2 = vmul.f32 0.70710677, %v2690_v47 }
 0xa69   :  { %3475 = vrot.lane.b32.xlu1 %v5288_v42, %s5706_s18 }
 0xa6a   :  { %3399 = vrot.lane.b32.xlu0 %v2465_v43, %s5706_s18 }
 0xa6d   :  { %3627 = vrot.lane.b32.xlu1 %v5299_v44, %s5706_s18 }
 0xa6e   :  { %3551 = vrot.lane.b32.xlu0 %v2540_v45, %s5706_s18 }
 0xa71   :  { %3779 = vrot.lane.b32.xlu1 %v5310_v1, %s5706_s18 }
 0xa72   :  { %3703 = vrot.lane.b32.xlu0 %v2615_v0, %s5706_s18 }
 0xa75   :  { %3931 = vrot.lane.b32.xlu1 %v5321_v46, %s5706_s18 }
 0xa76   :  { %3855 = vrot.lane.b32.xlu0 %v2690_v47, %s5706_s18 }
 0xabf   :  { %v2787_v52 = vpop.permute.xlu1 %2786 }
 0xac0   :  { %v2709_v50 = vpop.permute.xlu0 %2708 }
 0xac1   :  { %5323 = vmatpush3.xpose.msk.msra.mxu1 %vm439_vm2, %v2709_v50 }
 0xac2   :  { %5327 = vmatprep.subr.mxu1 %v5703_v54 }
 0xac4   :  { %5325 = vmatmul.mubr.msk.f32.vlgmr.msra.gmra.mrb[24].mxu1 %vm439_vm2, %v2699_v51 }
 0xac5   :  { %5328 = vmatpush3.xpose.msk.msra.mxu1 %vm439_vm2, %v2787_v52  ;;  %5329 = vmatprep.mubr.msk.f32.mxu1 %vm5704_vm1, %v5703_v54 }
 0xac6   :  { %5337 = vmatprep.subr.mxu1 %v5703_v54 }
 0xac7   :  { %v2943_v55 = vpop.permute.xlu1 %2942 }
 0xac8   :  { %5330 = vmatmul.mubr.msk.f32.vlgmr.msra.gmra.mrb[26].mxu1 %vm439_vm2, %v2700_v53 }
 0xac9   :  { %5338 = vmatpush3.xpose.msk.msra.mxu1 %vm439_vm2, %v2943_v55  ;;  %5339 = vmatprep.mubr.msk.f32.mxu1 %vm5704_vm1, %v5703_v54 }
 0xaca   :  { %5347 = vmatprep.subr.mxu1 %v5703_v54 }
 0xacb   :  { %v2865_v57 = vpop.permute.xlu1 %2864 }
 0xacc   :  { %5333 = vmatpush3.xpose.msk.msra.mxu0 %vm439_vm2, %v2865_v57  ;;  %5340 = vmatmul.mubr.msk.f32.vlgmr.msra.gmra.mrb[28].mxu1 %vm439_vm2, %v2702_v56 }
 0xacd   :  { %5342 = vmatprep.subr.mxu0 %v5703_v54  ;;  %5349 = vmatprep.mubr.msk.f32.mxu1 %vm5704_vm1, %v5703_v54 }
 0xacf   :  { %5335 = vmatmul.mubr.msk.f32.vlgmr.msra.gmra.mrb[36].mxu0 %vm439_vm2, %v2701_v38  ;;  %v3099_v58 = vpop.permute.xlu1 %3098 }
 0xad0   :  { %5348 = vmatpush3.xpose.msk.msra.mxu1 %vm439_vm2, %v3099_v58  ;;  %v3021_v59 = vpop.permute.xlu0 %3020  ;;  %5344 = vmatprep.mubr.msk.f32.mxu0 %vm5704_vm1, %v5703_v54 }
 0xad1   :  { %5343 = vmatpush3.xpose.msk.msra.mxu0 %vm439_vm2, %v3021_v59  ;;  %5357 = vmatprep.subr.mxu1 %v5703_v54 }
 0xad2   :  { %5352 = vmatprep.subr.mxu0 %v5703_v54 }
 0xad3   :  { %5350 = vmatmul.mubr.msk.f32.vlgmr.msra.gmra.mrb[30].mxu1 %vm439_vm2, %v2704_v39 }
 0xad4   :  { %5345 = vmatmul.mubr.msk.f32.vlgmr.msra.gmra.mrb[38].mxu0 %vm439_vm2, %v2703_v60  ;;  %5359 = vmatprep.mubr.msk.f32.mxu1 %vm5704_vm1, %v5703_v54 }
 0xad5   :  { %5354 = vmatprep.mubr.msk.f32.mxu0 %vm5704_vm1, %v5703_v54 }
 0xad7   :  { %v3255_v61 = vpop.permute.xlu1 %3254 }
 0xad8   :  { %5358 = vmatpush3.xpose.msk.msra.mxu1 %vm439_vm2, %v3255_v61  ;;  %v3177_v62 = vpop.permute.xlu0 %3176 }
 0xad9   :  { %5353 = vmatpush3.xpose.msk.msra.mxu0 %vm439_vm2, %v3177_v62  ;;  %5367 = vmatprep.subr.mxu1 %v5703_v54 }
 0xada   :  { %5362 = vmatprep.subr.mxu0 %v5703_v54 }
 0xadb   :  { %v3476_v3 = vpop.permute.xlu1 %3475  ;;  %5360 = vmatmul.mubr.msk.f32.vlgmr.msra.gmra.mrb[32].mxu1 %vm439_vm2, %v2706_v63 }
 0xadc   :  { %5368 = vmatpush3.msra.mxu1 %v3476_v3  ;;  %v3400_v4 = vpop.permute.xlu0 %3399  ;;  %5355 = vmatmul.mubr.msk.f32.vlgmr.msra.gmra.mrb[40].mxu0 %vm439_vm2, %v2705_v2 }
 0xadd   :  { %5363 = vmatpush3.msra.mxu0 %v3400_v4  ;;  %5364 = vmatprep.mubr.msk.f32.mxu0 %vm5704_vm1, %v5703_v54 }
 0xade   :  { %5369 = vmatprep.mubr.msk.f32.mxu1 %vm5704_vm1, %v5703_v54  ;;  %5372 = vmatprep.subr.mxu0 %v5703_v54 }
 0xadf   :  { %5377 = vmatprep.subr.mxu1 %v5703_v54 }
 0xb97   :  { %v2781_v5 = vpop.f32.mrb[24].mxu1 }
 0xb98   :  { %v5326_v6 = vpop.f32.mrb[25].mxu1  ;;  %v3331_v7 = vsel %vm5946_vm3, %v2781_v5, -inf }
 0xb99   :  { %v3339_v11 = vsel %vm439_vm2, %v3331_v7, -inf }
 0xb9b   :  { %v2859_v8 = vpop.f32.mrb[26].mxu1 }
 0xb9c   :  { %v3332_v9 = vsel %vm5946_vm3, %v2859_v8, -inf  ;;  %v5331_v10 = vpop.f32.mrb[27].mxu1 }
 0xb9d   :  { %v3340_v12 = vsel %vm439_vm2, %v3332_v9, -inf }
 0xb9e   :  { %v3341_v13 = vmax.f32 %v3339_v11, %v3340_v12 }
 0xb9f   :  { %v3015_v14 = vpop.f32.mrb[28].mxu1 }
 0xba0   :  { %v3351_v15 = vsub.f32 %v3331_v7, %v3341_v13  ;;  %v3352_v16 = vsub.f32 %v3332_v9, %v3341_v13  ;;  %v5341_v17 = vpop.f32.mrb[29].mxu1  ;;  %v3334_v18 = vsel %vm5946_vm3, %v3015_v14, -inf  ;;  %v3628_v14 = vpop.permute.xlu1 %3627 }
 0xba1   :  { %v3343_v25 = vsel %vm439_vm2, %v3334_v18, -inf }
 0xba2   :  { %v3359_v19 = vmul.f32 1.442695, %v3351_v15  ;;  %v3361_v20 = vmul.f32 1.442695, %v3352_v16  ;;  %v2937_v21 = vpop.f32.mrb[36].mxu0  ;;  %v3552_v15 = vpop.permute.xlu0 %3551 }
 0xba3   :  { %v3333_v23 = vsel %vm5946_vm3, %v2937_v21, -inf  ;;  %v5336_v24 = vpop.f32.mrb[37].mxu0 }
 0xba4   :  { %5671 = vpow2.f32 %v3359_v19  ;;  %v3342_v26 = vsel %vm439_vm2, %v3333_v23, -inf }
 0xba5   :  { %5673 = vpow2.f32 %v3361_v20  ;;  %v3344_v27 = vmax.f32 %v3342_v26, %v3343_v25  ;;  %v3780_v25 = vpop.permute.xlu1 %3779 }
 0xba6   :  { %v3171_v28 = vpop.f32.mrb[30].mxu1  ;;  %v3704_v26 = vpop.permute.xlu0 %3703 }
 0xba7   :  { %v3353_v29 = vsub.f32 %v3333_v23, %v3344_v27  ;;  %v3354_v30 = vsub.f32 %v3334_v18, %v3344_v27  ;;  %v3336_v31 = vsel %vm5946_vm3, %v3171_v28, -inf  ;;  %v3093_v32 = vpop.f32.mrb[38].mxu0  ;;  %v5351_v33 = vpop.f32.mrb[31].mxu1 }
 0xba8   :  { %v3346_v34 = vsel %vm439_vm2, %v3336_v31, -inf  ;;  %v3335_v35 = vsel %vm5946_vm3, %v3093_v32, -inf  ;;  %v5346_v36 = vpop.f32.mrb[39].mxu0 }
 0xba9   :  { %v3363_v37 = vmul.f32 1.442695, %v3353_v29  ;;  %v3365_v40 = vmul.f32 1.442695, %v3354_v30  ;;  %v3345_v41 = vsel %vm439_vm2, %v3335_v35, -inf  ;;  %v3932_v30 = vpop.permute.xlu1 %3931  ;;  %v4850_v36 = vld [vmem:[%s6494_s4 + $0x28] sm:$0xff] }
 0xbaa   :  { %v3347_v42 = vmax.f32 %v3345_v41, %v3346_v34 }
 0xbab   :  { %5675 = vpow2.f32 %v3363_v37  ;;  %v4852_v37 = vld [vmem:[%s6494_s4 + $0x38] sm:$0xff] }
 0xbac   :  { %5677 = vpow2.f32 %v3365_v40  ;;  %v3355_v43 = vsub.f32 %v3335_v35, %v3347_v42  ;;  %v3356_v44 = vsub.f32 %v3336_v31, %v3347_v42  ;;  %v3856_v31 = vpop.permute.xlu0 %3855  ;;  %v4849_v35 = vld [vmem:[%s6494_s4 + $0x20] sm:$0xff] }
 0xbae   :  { %v5672_v45 = vpop.eup %5671  ;;  %v3367_v1 = vmul.f32 1.442695, %v3355_v43  ;;  %v3369_v0 = vmul.f32 1.442695, %v3356_v44  ;;  %v3327_v46 = vpop.f32.mrb[32].mxu1 }
 0xbaf   :  { %v5674_v47 = vpop.eup %5673  ;;  %v3375_v50 = vsel %vm439_vm2, %v5672_v45, 0.0  ;;  %v3338_v51 = vsel %vm5946_vm3, %v3327_v46, -inf  ;;  %v3249_v52 = vpop.f32.mrb[40].mxu0 }
 0xbb0   :  { %v5361_v53 = vpop.f32.mrb[33].mxu1  ;;  %v3376_v55 = vsel %vm439_vm2, %v5674_v47, 0.0  ;;  %5679 = vpow2.f32 %v3367_v1  ;;  %v3349_v56 = vsel %vm439_vm2, %v3338_v51, -inf  ;;  %v3337_v57 = vsel %vm5946_vm3, %v3249_v52, -inf  ;;  %v5356_v38 = vpop.f32.mrb[41].mxu0 }
 0xbb1   :  { %v3377_v58 = vadd.f32 %v3376_v55, %v3375_v50  ;;  %5681 = vpow2.f32 %v3369_v0  ;;  %v3348_v59 = vsel %vm439_vm2, %v3337_v57, -inf }
 0xbb2   :  { %v3350_v39 = vmax.f32 %v3348_v59, %v3349_v56 }
 0xbb3   :  { %5683 = vrcp.f32 %v3377_v58 }
 0xbb4   :  { %v3357_v60 = vsub.f32 %v3337_v57, %v3350_v39  ;;  %v3358_v61 = vsub.f32 %v3338_v51, %v3350_v39 }
 0xbb5   :  { %v5676_v62 = vpop.eup %5675 }
 0xbb6   :  { %v5678_v63 = vpop.eup %5677  ;;  %v3378_v2 = vsel %vm439_vm2, %v5676_v62, 0.0  ;;  %v3371_v3 = vmul.f32 1.442695, %v3357_v60  ;;  %v3373_v4 = vmul.f32 1.442695, %v3358_v61 }
 0xbb7   :  { %v3379_v5 = vsel %vm439_vm2, %v5678_v63, 0.0 }
 0xbb8   :  { %v3380_v6 = vadd.f32 %v3379_v5, %v3378_v2  ;;  %5685 = vpow2.f32 %v3371_v3 }
 0xbb9   :  { %5687 = vpow2.f32 %v3373_v4 }
 0xbba   :  { %v5680_v22 = vpop.eup %5679  ;;  %5689 = vrcp.f32 %v3380_v6 }
 0xbbb   :  { %v5682_v7 = vpop.eup %5681  ;;  %v3381_v8 = vsel %vm439_vm2, %v5680_v22, 0.0 }
 0xbbc   :  { %v3382_v9 = vsel %vm439_vm2, %v5682_v7, 0.0 }
 0xbbd   :  { %v5684_v10 = vpop.eup %5683  ;;  %v3383_v11 = vadd.f32 %v3382_v9, %v3381_v8 }
 0xbbe   :  { %v3391_v12 = vmul.f32 %v5684_v10, %v5672_v45  ;;  %v3392_v13 = vmul.f32 %v5684_v10, %v5674_v47 }
 0xbbf   :  { %5691 = vrcp.f32 %v3383_v11 }
 0xbc0   :  { %5365 = vmatmul.mubr.msk.f32.vlgmr.msra.gmra.mrb[42].mxu0 %vm439_vm2, %v3391_v12  ;;  %5370 = vmatmul.mubr.msk.f32.vlgmr.msra.gmra.mrb[34].mxu1 %vm439_vm2, %v3392_v13 }
 0xbc1   :  { %5373 = vmatpush3.msra.mxu0 %v3552_v15  ;;  %5378 = vmatpush3.msra.mxu1 %v3628_v14  ;;  %v4862_v14 = vld [vmem:[%s6495_s5 + $0x1] ss:$0 sm:$0xff] }
 0xbc2   :  { %v5686_v16 = vpop.eup %5685  ;;  %5374 = vmatprep.mubr.msk.f32.mxu0 %vm5704_vm1, %v5703_v54  ;;  %5379 = vmatprep.mubr.msk.f32.mxu1 %vm5704_vm1, %v5703_v54 }
 0xbc3   :  { %v5688_v17 = vpop.eup %5687  ;;  %v3384_v18 = vsel %vm439_vm2, %v5686_v16, 0.0  ;;  %5382 = vmatprep.subr.mxu0 %v5703_v54  ;;  %5387 = vmatprep.subr.mxu1 %v5703_v54 }
 0xbc4   :  { %v5690_v19 = vpop.eup %5689  ;;  %v3385_v20 = vsel %vm439_vm2, %v5688_v17, 0.0 }
 0xbc5   :  { %v3386_v21 = vadd.f32 %v3385_v20, %v3384_v18  ;;  %v3393_v23 = vmul.f32 %v5690_v19, %v5676_v62  ;;  %v3394_v24 = vmul.f32 %v5690_v19, %v5678_v63 }
 0xbc7   :  { %5693 = vrcp.f32 %v3386_v21  ;;  %5375 = vmatmul.mubr.msk.f32.vlgmr.msra.gmra.mrb[44].mxu0 %vm439_vm2, %v3393_v23  ;;  %5380 = vmatmul.mubr.msk.f32.vlgmr.msra.gmra.mrb[36].mxu1 %vm439_vm2, %v3394_v24 }
 0xbc8   :  { %5383 = vmatpush3.msra.mxu0 %v3704_v26  ;;  %5388 = vmatpush3.msra.mxu1 %v3780_v25 }
 0xbc9   :  { %v5692_v27 = vpop.eup %5691  ;;  %5384 = vmatprep.mubr.msk.f32.mxu0 %vm5704_vm1, %v5703_v54  ;;  %5389 = vmatprep.mubr.msk.f32.mxu1 %vm5704_vm1, %v5703_v54 }
 0xbca   :  { %5392 = vmatprep.subr.mxu0 %v5703_v54  ;;  %5397 = vmatprep.subr.mxu1 %v5703_v54  ;;  %v3395_v28 = vmul.f32 %v5692_v27, %v5680_v22  ;;  %v3396_v29 = vmul.f32 %v5692_v27, %v5682_v7 }
 0xbcc   :  { %5385 = vmatmul.mubr.msk.f32.vlgmr.msra.gmra.mrb[46].mxu0 %vm439_vm2, %v3395_v28  ;;  %5390 = vmatmul.mubr.msk.f32.vlgmr.msra.gmra.mrb[38].mxu1 %vm439_vm2, %v3396_v29 }
 0xbcd   :  { %5393 = vmatpush3.msra.mxu0 %v3856_v31  ;;  %5398 = vmatpush3.msra.mxu1 %v3932_v30  ;;  %v4867_v30 = vld [vmem:[%s6496_s8 + $0x20] sm:$0xff]  ;;  %v4868_v31 = vld [vmem:[%s6496_s8 + $0x28] sm:$0xff] }
 0xbce   :  { %5394 = vmatprep.mubr.msk.f32.mxu0 %vm5704_vm1, %v5703_v54  ;;  %5399 = vmatprep.mubr.msk.f32.mxu1 %vm5704_vm1, %v5703_v54  ;;  %v4851_v54 = vld [vmem:[%s6494_s4 + $0x30] sm:$0xff] }
 0xbcf   :  { %5402 = vmatprep.subr.mxu0 %v4849_v35  ;;  %5407 = vmatprep.subr.mxu1 %v4850_v36 }
 0xbd1   :  { %v5694_v32 = vpop.eup %5693 }
 0xbd2   :  { %v3397_v33 = vmul.f32 %v5694_v32, %v5686_v16  ;;  %v3398_v34 = vmul.f32 %v5694_v32, %v5688_v17  ;;  %v5583_v32 = vpack.c.bf16 %v4868_v31, %v4867_v30 }
 0xbd4   :  { %5395 = vmatmul.mubr.msk.f32.vlgmr.msra.gmra.mrb[48].mxu0 %vm439_vm2, %v3397_v33  ;;  %5400 = vmatmul.mubr.msk.f32.vlgmr.msra.gmra.mrb[40].mxu1 %vm439_vm2, %v3398_v34  ;;  %v4869_v33 = vld [vmem:[%s6496_s8 + $0x30] sm:$0xff]  ;;  %v4870_v34 = vld [vmem:[%s6496_s8 + $0x38] sm:$0xff] }
 0xbd5   :  { %5403 = vmatpush3.msra.mxu0 %v4849_v35  ;;  %5408 = vmatpush3.msra.mxu1 %v4850_v36  ;;  %v5587_v35 = vpack.c.bf16 %v4870_v34, %v4869_v33  ;;  %v4875_v36 = vld [vmem:[%s6497_s10 + $0x80] sm:$0xff] }
 0xbd6   :  { %5412 = vmatprep.subr.mxu0 %v4851_v54  ;;  %5417 = vmatprep.subr.mxu1 %v4852_v37 }
 0xc93   :  { %v3471_v40 = vpop.f32.mrb[42].mxu0  ;;  %v3547_v41 = vpop.f32.mrb[34].mxu1 }
 0xc94   :  { %v5366_v42 = vpop.f32.mrb[43].mxu0  ;;  %v5371_v43 = vpop.f32.mrb[35].mxu1  ;;  %5404 = vmatprep.mubr.msk.f32.mxu0 %vm439_vm2, %v3471_v40 }
 0xc95   :  { %5405 = vmatmul.mubr.msk.f32.vlgmr.msra.gmra.mrb[50].mxu0 %vm439_vm2, %v3547_v41  ;;  %v4878_v41 = vld [vmem:[%s6497_s10 + $0x98] sm:$0xff]  ;;  %v4879_v43 = vld [vmem:[%s6497_s10 + $0xa0] sm:$0xff] }
 0xc96   :  { %5413 = vmatpush3.msra.mxu0 %v4851_v54  ;;  %v4876_v54 = vld [vmem:[%s6497_s10 + $0x88] sm:$0xff] }
 0xc97   :  { %5584 = vmatprep.subr.bf16.mxu0 %v5583_v32  ;;  %v5591_v40 = vpack.c.bf16 %v4876_v54, %v4875_v36 }
 0xc9a   :  { %v3623_v44 = vpop.f32.mrb[44].mxu0  ;;  %v3699_v45 = vpop.f32.mrb[36].mxu1 }
 0xc9b   :  { %v5376_v1 = vpop.f32.mrb[45].mxu0  ;;  %v5381_v0 = vpop.f32.mrb[37].mxu1  ;;  %5409 = vmatprep.mubr.msk.f32.mxu1 %vm439_vm2, %v3623_v44  ;;  %v4880_v44 = vld [vmem:[%s6497_s10 + $0xa8] sm:$0xff] }
 0xc9c   :  { %5410 = vmatmul.mubr.msk.f32.vlgmr.msra.gmra.mrb[42].mxu1 %vm439_vm2, %v3699_v45  ;;  %v5599_v45 = vpack.c.bf16 %v4880_v44, %v4879_v43  ;;  %v4881_v1 = vld [vmem:[%s6497_s10 + $0xb0] sm:$0xff]  ;;  %v4882_v0 = vld [vmem:[%s6497_s10 + $0xb8] sm:$0xff] }
 0xc9d   :  { %5418 = vmatpush3.msra.mxu1 %v4852_v37  ;;  %v4877_v37 = vld [vmem:[%s6497_s10 + $0x90] sm:$0xff]  ;;  %v4653_v43 = vld [vmem:[%s6502_s14 + $0x18] sm:$0xff] }
 0xc9e   :  { %v5595_v42 = vpack.c.bf16 %v4878_v41, %v4877_v37  ;;  %5592 = vmatprep.subr.bf16.mxu1 %v5591_v40 }
 0xc9f   :  { %v3775_v46 = vpop.f32.mrb[46].mxu0  ;;  %v3851_v47 = vpop.f32.mrb[38].mxu1 }
 0xca0   :  { %v5386_v50 = vpop.f32.mrb[47].mxu0  ;;  %v5391_v51 = vpop.f32.mrb[39].mxu1  ;;  %5414 = vmatprep.mubr.msk.f32.mxu0 %vm439_vm2, %v3775_v46  ;;  %v5603_v46 = vpack.c.bf16 %v4882_v0, %v4881_v1 }
 0xca1   :  { %5415 = vmatmul.mubr.msk.f32.vlgmr.msra.gmra.mrb[52].mxu0 %vm439_vm2, %v3851_v47  ;;  %v4883_v47 = vld [vmem:[%s6497_s10 + $0xc0] sm:$0xff]  ;;  %v4884_v50 = vld [vmem:[%s6497_s10 + $0xc8] sm:$0xff] }
 0xca2   :  { %5586 = vmatpush3.bf16.msra.mxu0 %v5583_v32  ;;  %v5607_v51 = vpack.c.bf16 %v4884_v50, %v4883_v47 }
 0xca3   :  { %5588 = vmatprep.subr.bf16.mxu0 %v5587_v35 }
 0xca6   :  { %5590 = vmatpush3.bf16.msra.mxu0 %v5587_v35 }
 0xca7   :  { %v3927_v52 = vpop.f32.mrb[48].mxu0  ;;  %v4003_v53 = vpop.f32.mrb[40].mxu1 }
 0xca8   :  { %v5396_v55 = vpop.f32.mrb[49].mxu0  ;;  %v5401_v56 = vpop.f32.mrb[41].mxu1  ;;  %5419 = vmatprep.mubr.msk.f32.mxu1 %vm439_vm2, %v3927_v52  ;;  %v4885_v52 = vld [vmem:[%s6497_s10 + $0xd0] sm:$0xff] }
 0xca9   :  { %5420 = vmatmul.mubr.msk.f32.vlgmr.msra.gmra.mrb[44].mxu1 %vm439_vm2, %v4003_v53  ;;  %v4886_v53 = vld [vmem:[%s6497_s10 + $0xd8] sm:$0xff]  ;;  %v4887_v56 = vld [vmem:[%s6497_s10 + $0xe0] sm:$0xff] }
 0xcaa   :  { %5594 = vmatpush3.bf16.msra.mxu1 %v5591_v40  ;;  %v5611_v55 = vpack.c.bf16 %v4886_v53, %v4885_v52  ;;  %v4651_v40 = vld [vmem:[%s6502_s14 + $0x8] sm:$0xff]  ;;  %v4893_v52 = vld [vmem:[%s6503_s12] ss:$0 sm:$0xff] }
 0xcab   :  { %5596 = vmatprep.subr.bf16.mxu1 %v5595_v42 }
 0xcae   :  { %5598 = vmatpush3.bf16.msra.mxu1 %v5595_v42  ;;  %v4652_v42 = vld [vmem:[%s6502_s14 + $0x10] sm:$0xff] }
 0xcaf   :  { %5600 = vmatprep.subr.bf16.mxu1 %v5599_v45  ;;  %v5627_v44 = vpack.c.bf16 %v4653_v43, %v4652_v42 }
 0xcb2   :  { %5602 = vmatpush3.bf16.msra.mxu1 %v5599_v45 }
 0xcb3   :  { %5604 = vmatprep.subr.bf16.mxu1 %v5603_v46 }
 0xcb6   :  { %5606 = vmatpush3.bf16.msra.mxu1 %v5603_v46 }
 0xcb7   :  { %5608 = vmatprep.subr.bf16.mxu1 %v5607_v51 }
 0xcba   :  { %5610 = vmatpush3.bf16.msra.mxu1 %v5607_v51 }
 0xcbb   :  { %5612 = vmatprep.subr.bf16.mxu1 %v5611_v55 }
 0xcbe   :  { %5614 = vmatpush3.bf16.msra.mxu1 %v5611_v55 }
 0xd68   :  { %v5406_v57 = vpop.f32.mrb[50].mxu0 }
 0xd69   :  { %v4084_v38 = vpop.f32.mrb[51].mxu0  ;;  %v4343_v59 = vsel %vm62_vm0, %v5406_v57, 0.0  ;;  %v4888_v57 = vld [vmem:[%s6497_s10 + $0xe8] sm:$0xff] }
 0xd6a   :  { %v4336_v61 = vsel %vm62_vm0, %v4084_v38, 0.0  ;;  %v5615_v38 = vpack.c.bf16 %v4888_v57, %v4887_v56  ;;  %v4894_v57 = vld [vmem:[%s6504_s13] ss:$0 sm:$0xff] }
 0xd6c   :  { %5616 = vmatprep.subr.bf16.mxu1 %v5615_v38 }
 0xd6d   :  { %5618 = vmatpush3.bf16.msra.mxu1 %v5615_v38 }
 0xd6f   :  { %v5411_v58 = vpop.f32.mrb[42].mxu1 }
 0xd70   :  { %v4344_v39 = vsel %vm62_vm0, %v5411_v58, 0.0  ;;  %v4165_v60 = vpop.f32.mrb[43].mxu1 }
 0xd71   :  { %v4345_v62 = vadd.f32 %v4344_v39, %v4343_v59  ;;  %v4337_v63 = vsel %vm62_vm0, %v4165_v60, 0.0 }
 0xd72   :  { %v4338_v2 = vadd.f32 %v4337_v63, %v4336_v61 }
 0xd74   :  { %v5416_v3 = vpop.f32.mrb[52].mxu0 }
 0xd75   :  { %v4346_v4 = vsel %vm62_vm0, %v5416_v3, 0.0  ;;  %v4246_v5 = vpop.f32.mrb[53].mxu0 }
 0xd76   :  { %v4347_v6 = vadd.f32 %v4346_v4, %v4345_v62  ;;  %v4339_v22 = vsel %vm62_vm0, %v4246_v5, 0.0  ;;  %v4866_v4 = vld [vmem:[%s6499_s7 + $0x1] ss:$0 sm:$0xff] }
 0xd77   :  { %v4340_v7 = vadd.f32 %v4339_v22, %v4338_v2  ;;  %v4865_v2 = vld [vmem:[%s6498_s6 + $0x1] ss:$0 sm:$0xff] }
 0xd7c   :  { %v5421_v8 = vpop.f32.mrb[44].mxu1 }
 0xd7d   :  { %v4348_v9 = vsel %vm62_vm0, %v5421_v8, 0.0  ;;  %v4327_v10 = vpop.f32.mrb[45].mxu1 }
 0xd7e   :  { %v4349_v11 = vadd.f32 %v4348_v9, %v4347_v6  ;;  %v4341_v12 = vsel %vm62_vm0, %v4327_v10, 0.0  ;;  %v4889_v10 = vld [vmem:[%s6497_s10 + $0xf0] sm:$0xff] }
 0xd7f   :  { %v4342_v13 = vadd.f32 %v4341_v12, %v4340_v7 }
 0xd80   :  { %v4351_v15 = vadd.f32 %v4349_v11, %v6139_v48  ;;  %v4890_v11 = vld [vmem:[%s6497_s10 + $0xf8] sm:$0xff] }
 0xd81   :  { %v4350_v16 = vadd.f32 %v4342_v13, %v6142_v49  ;;  %v5619_v12 = vpack.c.bf16 %v4890_v11, %v4889_v10  ;;  %v4872_v13 = vld [vmem:[%s6500_s9 + $0x1] ss:$0 sm:$0xff] }
 0xd82   :  { %v6364_v17 = vadd.f32 %v4862_v14, %v4351_v15 }
 0xd83   :  { %v6366_v18 = vadd.f32 %v4862_v14, %v4350_v16  ;;  %5620 = vmatprep.subr.bf16.mxu1 %v5619_v12 }
 0xd84   :  { %v4369_v19 = vsel %vm62_vm0, %v6364_v17, 0.0  ;;  %5622 = vmatpush3.bf16.msra.mxu1 %v5619_v12 }
 0xd85   :  { %4370 = vadd.xlane.f32.xlu1 %v4369_v19  ;;  %v4366_v20 = vsel %vm62_vm0, %v6366_v18, 0.0 }
 0xd86   :  { %4367 = vadd.xlane.f32.xlu0 %v4366_v20 }
 0xe12   :  { %v4371_v21 = vpop.xlane.xlu1 %4370 }
 0xe13   :  { %v4373_v23 = vmul.f32 0.03125, %v4371_v21  ;;  %v4368_v24 = vpop.xlane.xlu0 %4367 }
 0xe14   :  { %v4372_v25 = vmul.f32 0.03125, %v4368_v24 }
 0xe15   :  { %v6373_v48 = vsub.f32 %v6364_v17, %v4373_v23  ;;  %v4892_v23 = vld [vmem:[%s6501_s11 + $0x1] ss:$0 sm:$0xff] }
 0xe16   :  { %v4374_v49 = vsub.f32 %v6366_v18, %v4372_v25 }
 0xe17   :  { %v4377_v28 = vmul.f32 %v6373_v48, %v6373_v48 }
 0xe18   :  { %v4376_v26 = vmul.f32 %v4374_v49, %v4374_v49 }
 0xe19   :  { %v4381_v29 = vsel %vm62_vm0, %v4377_v28, 0.0 }
 0xe1a   :  { %v4378_v27 = vsel %vm62_vm0, %v4376_v26, 0.0 }
 0xe1b   :  { %4379 = vadd.xlane.f32.xlu0 %v4378_v27 }
 0xe1f   :  { %4382 = vadd.xlane.f32.xlu0 %v4381_v29 }
 0xea8   :  { %v4380_v58 = vpop.xlane.xlu0 %4379 }
 0xea9   :  { %v4384_v59 = vmul.f32 0.03125, %v4380_v58 }
 0xeab   :  { %v4386_v39 = vadd.f32 1e-05, %v4384_v59 }
 0xeac   :  { %v4383_v60 = vpop.xlane.xlu0 %4382 }
 0xead   :  { %5695 = vrsqrt.f32 %v4386_v39  ;;  %v4385_v61 = vmul.f32 0.03125, %v4383_v60  ;;  %v4895_v60 = vld [vmem:[%s6505_s15] ss:$0 sm:$0xff] }
 0xeaf   :  { %v4387_v62 = vadd.f32 1e-05, %v4385_v61 }
 0xeb1   :  { %5697 = vrsqrt.f32 %v4387_v62 }
 0xeb7   :  { %v5696_v63 = vpop.eup %5695 }
 0xeb8   :  { %v4390_v3 = vmul.f32 %v5696_v63, %v4374_v49 }
 0xeba   :  { %v4398_v5 = vmul.f32 %v4865_v2, %v4390_v3 }
 0xebb   :  { %v5698_v6 = vpop.eup %5697 }
 0xebc   :  { %v4391_v22 = vmul.f32 %v5698_v6, %v6373_v48  ;;  %v4406_v7 = vadd.f32 %v4866_v4, %v4398_v5 }
 0xebe   :  { %v4399_v8 = vmul.f32 %v4865_v2, %v4391_v22  ;;  %5430 = vmatprep.mubr.msk.f32.mxu0 %vm62_vm0, %v4406_v7 }
 0xec0   :  { %v4407_v9 = vadd.f32 %v4866_v4, %v4399_v8 }
 0xec2   :  { %5431 = vmatmul.mubr.msk.f32.vlgmr.msra.gmra.mrb[54].mxu0 %vm62_vm0, %v4407_v9 }
 0xf95   :  { %v5432_v14 = vpop.f32.mrb[54].mxu0 }
 0xf96   :  { %v4499_v15 = vadd.f32 %v5432_v14, %v4872_v13  ;;  %v4493_v16 = vpop.f32.mrb[55].mxu0 }
 0xf97   :  { %v4494_v19 = vadd.f32 %v4872_v13, %v4493_v16 }
 0xf98   :  { %v4503_v21 = vmax.f32 %v4499_v15, 0.0 }
 0xf99   :  { %v4502_v20 = vmax.f32 %v4494_v19, 0.0 }
 0xf9b   :  { %5465 = vmatprep.mubr.f32.mxu1 %v4502_v20 }
 0xf9c   :  { %5466 = vmatmul.mubr.f32.vlgmr.msra.gmra.mrb[46].mxu1 %v4503_v21 }
0x106f   :  { %v5467_v24 = vpop.f32.mrb[46].mxu1 }
0x1070   :  { %v4601_v25 = vadd.f32 %v5467_v24, %v4892_v23  ;;  %v4595_v48 = vpop.f32.mrb[47].mxu1 }
0x1071   :  { %v4596_v49 = vadd.f32 %v4892_v23, %v4595_v48 }
0x1072   :  { %v4605_v26 = vadd.f32 %v4601_v25, %v6364_v17 }
0x1073   :  { %v4604_v27 = vadd.f32 %v4596_v49, %v6366_v18  ;;  %v4650_v18 = vld [vmem:[%s6502_s14] sm:$0xff] }
0x1074   :  { %v4611_v28 = vsel %vm62_vm0, %v4605_v26, 0.0  ;;  %v5623_v41 = vpack.c.bf16 %v4651_v40, %v4650_v18 }
0x1075   :  { %4612 = vadd.xlane.f32.xlu1 %v4611_v28  ;;  %v4608_v29 = vsel %vm62_vm0, %v4604_v27, 0.0 }
0x1076   :  { %4609 = vadd.xlane.f32.xlu0 %v4608_v29  ;;  %5624 = vmatprep.subr.bf16.mxu0 %v5623_v41 }
0x1077   :  { %5626 = vmatpush3.bf16.msra.mxu0 %v5623_v41 }
0x1078   :  { %5628 = vmatprep.subr.bf16.mxu0 %v5627_v44 }
0x107b   :  { %5630 = vmatpush3.bf16.msra.mxu0 %v5627_v44 }
0x1102   :  { %v4613_v30 = vpop.xlane.xlu1 %4612 }
0x1103   :  { %v4615_v31 = vmul.f32 0.03125, %v4613_v30  ;;  %v4610_v32 = vpop.xlane.xlu0 %4609 }
0x1104   :  { %v4614_v33 = vmul.f32 0.03125, %v4610_v32 }
0x1105   :  { %v4617_v34 = vsub.f32 %v4605_v26, %v4615_v31 }
0x1106   :  { %v4616_v35 = vsub.f32 %v4604_v27, %v4614_v33 }
0x1107   :  { %v4619_v36 = vmul.f32 %v4617_v34, %v4617_v34 }
0x1108   :  { %v4618_v54 = vmul.f32 %v4616_v35, %v4616_v35 }
0x1109   :  { %v4623_v37 = vsel %vm62_vm0, %v4619_v36, 0.0 }
0x110a   :  { %4624 = vadd.xlane.f32.xlu1 %v4623_v37  ;;  %v4620_v17 = vsel %vm62_vm0, %v4618_v54, 0.0 }
0x110b   :  { %4621 = vadd.xlane.f32.xlu0 %v4620_v17 }
0x1197   :  { %v4625_v45 = vpop.xlane.xlu1 %4624 }
0x1198   :  { %v4627_v1 = vmul.f32 0.03125, %v4625_v45  ;;  %v4622_v0 = vpop.xlane.xlu0 %4621 }
0x1199   :  { %v4626_v46 = vmul.f32 0.03125, %v4622_v0 }
0x119a   :  { %v4629_v47 = vadd.f32 1e-05, %v4627_v1 }
0x119b   :  { %v4628_v50 = vadd.f32 1e-05, %v4626_v46 }
0x119c   :  { %5699 = vrsqrt.f32 %v4629_v47 }
0x119d   :  { %5701 = vrsqrt.f32 %v4628_v50 }
0x11a6   :  { %v5700_v51 = vpop.eup %5699 }
0x11a7   :  { %v5702_v53 = vpop.eup %5701  ;;  %v4633_v55 = vmul.f32 %v5700_v51, %v4617_v34 }
0x11a8   :  { %v4632_v56 = vmul.f32 %v5702_v53, %v4616_v35 }
0x11a9   :  { %v4641_v38 = vmul.f32 %v4893_v52, %v4633_v55 }
0x11aa   :  { %v4640_v58 = vmul.f32 %v4893_v52, %v4632_v56 }
0x11ab   :  { %v4649_v39 = vadd.f32 %v4894_v57, %v4641_v38 }
0x11ac   :  { %v4648_v59 = vadd.f32 %v4894_v57, %v4640_v58 }
0x11ae   :  { %5476 = vmatprep.mubr.msk.f32.mxu0 %vm62_vm0, %v4648_v59 }
0x11af   :  { %5477 = vmatmul.mubr.msk.f32.vlgmr.msra.gmra.mrb[56].mxu0 %vm62_vm0, %v4649_v39 }
0x1282   :  { %v5478_v61 = vpop.f32.mrb[56].mxu0 }
0x1283   :  { %v4739_v62 = vadd.f32 %v5478_v61, %v4895_v60  ;;  %v4733_v63 = vpop.f32.mrb[57].mxu0 }
0x1284   :  { %v4734_v2 = vadd.f32 %v4895_v60, %v4733_v63 }
0x1285   :  { %4743 = vst [vmem:[%s6506_s16 + $0x8] sm:$0xff] %v4739_v62 }
0x1286   :  { %4742 = vst [vmem:[%s6506_s16] sm:$0xff] %v4734_v2 }

</bundles_post_ra>
